<compile_context>
chip_gen: v7x
topology: tpu7x:2x2x1
jax: 0.10.0
libtpu: 0.0.40
codegen_flags: <defaults>
</compile_context>

<pallas_src>
import functools

import jax
import jax.numpy as jnp
from jax.experimental import pallas as pl
from jax.experimental.pallas import tpu as pltpu

IN_DIM = 512      # 256 * 2
HID = 512
OUT_DIM = 256


def relation_mlp_kernel(x_ref,
                        w1_ref, b1_ref,
                        w2_ref, b2_ref,
                        w3_ref, b3_ref,
                        w4_ref, b4_ref,
                        o_ref):
    """One batch tile of x (bf16); all weights (bf16) / biases (f32) resident."""

    def layer(h_bf16, w_ref, b_ref):
        # bf16 x bf16 -> f32 accumulation on the MXU; bias + ReLU in f32 (VPU).
        acc = jnp.dot(h_bf16, w_ref[...], preferred_element_type=jnp.float32)
        return jnp.maximum(acc + b_ref[...], 0.0)

    h = x_ref[...]                                            # (tile_m, 512) bf16
    h = layer(h, w1_ref, b1_ref).astype(jnp.bfloat16)         # fc1 + relu
    h = layer(h, w2_ref, b2_ref).astype(jnp.bfloat16)         # fc2 + relu
    h = layer(h, w3_ref, b3_ref).astype(jnp.bfloat16)         # fc3 + relu
    h = layer(h, w4_ref, b4_ref)                              # fc4 + relu (f32)
    o_ref[...] = h.astype(o_ref.dtype)


@functools.partial(jax.jit, static_argnames=("tile_m",))
def _relation_pallas(x_bf16, w1, b1, w2, b2, w3, b3, w4, b4, *, tile_m):
    Bp = x_bf16.shape[0]
    grid = (Bp // tile_m,)

    full = lambda shape: pl.BlockSpec(shape, lambda i: (0, 0))

    return pl.pallas_call(
        relation_mlp_kernel,
        out_shape=jax.ShapeDtypeStruct((Bp, OUT_DIM), jnp.float32),
        grid_spec=pltpu.PrefetchScalarGridSpec(
            num_scalar_prefetch=0,
            grid=grid,
            in_specs=[
                pl.BlockSpec((tile_m, IN_DIM), lambda i: (i, 0)),  # x tile
                full((IN_DIM, HID)),  full((1, HID)),              # fc1
                full((HID, HID)),     full((1, HID)),              # fc2
                full((HID, HID)),     full((1, HID)),              # fc3
                full((HID, OUT_DIM)), full((1, OUT_DIM)),          # fc4
            ],
            out_specs=pl.BlockSpec((tile_m, OUT_DIM), lambda i: (i, 0)),
        ),
        compiler_params=pltpu.CompilerParams(
            dimension_semantics=("parallel",),   # batch tiles shard across TCs
        ),
    )(x_bf16, w1, b1, w2, b2, w3, b3, w4, b4)


def relation_module_forward(x, params, *, tile_m=512):
    """x: (B, 512) float32.  params: pre-transposed weights/biases (any float dtype).

    Returns (B, 256) float32 (matching the PyTorch module's output dtype).
    """
    B, D = x.shape
    assert D == IN_DIM

    # Matmul operands in bf16 (f32 accumulation in-kernel); biases stay f32.
    x_bf16 = x.astype(jnp.bfloat16)
    w = [params[k].astype(jnp.bfloat16) for k in ("w1", "w2", "w3", "w4")]
    b = [params[k].astype(jnp.float32) for k in ("b1", "b2", "b3", "b4")]

    if B <= tile_m:
        # Tiny / moderate batch: single grid step, whole batch in one tile
        # (block equals full array extent on the batch axis, so no (8,128)
        # divisibility requirement and no per-step grid overhead).
        tm, Bp = B, B
    else:
        tm = tile_m
        Bp = pl.cdiv(B, tm) * tm
        if Bp != B:
            x_bf16 = jnp.pad(x_bf16, ((0, Bp - B), (0, 0)))

    out = _relation_pallas(x_bf16,
                           w[0], b[0], w[1], b[1], w[2], b[2], w[3], b[3],
                           tile_m=tm)
    return out[:B] if Bp != B else out


def init_params(key):
    """Deterministic init mirroring nn.Linear shapes, stored as (in, out), f32."""
    ks = jax.random.split(key, 8)

    def linear(kw, kb, fan_in, fan_out):
        bound = 1.0 / jnp.sqrt(fan_in)
        wgt = jax.random.uniform(kw, (fan_in, fan_out), jnp.float32, -bound, bound)
        bias = jax.random.uniform(kb, (1, fan_out), jnp.float32, -bound, bound)
        return wgt, bias

    w1, b1 = linear(ks[0], ks[1], IN_DIM, HID)
    w2, b2 = linear(ks[2], ks[3], HID, HID)
    w3, b3 = linear(ks[4], ks[5], HID, HID)
    w4, b4 = linear(ks[6], ks[7], HID, OUT_DIM)
    return dict(w1=w1, b1=b1, w2=w2, b2=b2, w3=w3, b3=b3, w4=w4, b4=b4)


def reference_forward_f32(x, p):
    """Pure f32 reference (exact semantics of the PyTorch module)."""
    h = jnp.maximum(x @ p["w1"] + p["b1"], 0.0)
    h = jnp.maximum(h @ p["w2"] + p["b2"], 0.0)
    h = jnp.maximum(h @ p["w3"] + p["b3"], 0.0)
    h = jnp.maximum(h @ p["w4"] + p["b4"], 0.0)
    return h


def reference_forward_bf16(x, p):
    """Reference with the same bf16-operand / f32-accumulate recipe as the kernel."""
    def layer(h, wgt, bias):
        acc = jnp.dot(h.astype(jnp.bfloat16), wgt.astype(jnp.bfloat16),
                      preferred_element_type=jnp.float32)
        return jnp.maximum(acc + bias, 0.0)
    h = layer(x, p["w1"], p["b1"])
    h = layer(h, p["w2"], p["b2"])
    h = layer(h, p["w3"], p["b3"])
    h = layer(h, p["w4"], p["b4"])
    return h


if __name__ == "__main__":
    key = jax.random.PRNGKey(0)
    k_x1, k_x2, k_p = jax.random.split(key, 3)
    params = init_params(k_p)

    # Case 1: tiny batch -> single-grid-step path (grid=(1,)).
    b_small = 16
    x_small = jax.random.normal(k_x1, (b_small, IN_DIM), jnp.float32)
    out_small = jax.block_until_ready(relation_module_forward(x_small, params))
    assert out_small.shape == (b_small, OUT_DIM)
    assert jnp.allclose(out_small, reference_forward_bf16(x_small, params),
                        atol=1e-2, rtol=1e-2), "small-batch mismatch vs bf16 reference"
    assert jnp.allclose(out_small, reference_forward_f32(x_small, params),
                        atol=1e-1, rtol=1e-1), "small-batch mismatch vs f32 reference"

    # Case 2: larger, non-divisible batch -> tiled + padded path (grid=(3,), tile_m=256).
    b_big = 640
    x_big = jax.random.normal(k_x2, (b_big, IN_DIM), jnp.float32)
    out_big = jax.block_until_ready(
        relation_module_forward(x_big, params, tile_m=256))
    assert out_big.shape == (b_big, OUT_DIM)
    assert jnp.allclose(out_big, reference_forward_bf16(x_big, params),
                        atol=1e-2, rtol=1e-2), "tiled mismatch vs bf16 reference"
    assert jnp.allclose(out_big, reference_forward_f32(x_big, params),
                        atol=1e-1, rtol=1e-1), "tiled mismatch vs f32 reference"

    print("KERNEL_OK")
</pallas_src>

<mosaic_0001>
module attributes {stable_mosaic.version = 11 : i64} {
  func.func @relation_mlp_kernel(%arg0: i32, %arg1: memref<16x512xbf16, #tpu.memory_space<vmem>>, %arg2: memref<512x512xbf16, #tpu.memory_space<vmem>>, %arg3: memref<1x512xf32, #tpu.memory_space<vmem>>, %arg4: memref<512x512xbf16, #tpu.memory_space<vmem>>, %arg5: memref<1x512xf32, #tpu.memory_space<vmem>>, %arg6: memref<512x512xbf16, #tpu.memory_space<vmem>>, %arg7: memref<1x512xf32, #tpu.memory_space<vmem>>, %arg8: memref<512x256xbf16, #tpu.memory_space<vmem>>, %arg9: memref<1x256xf32, #tpu.memory_space<vmem>>, %arg10: memref<16x256xf32, #tpu.memory_space<vmem>>) attributes {dimension_semantics = [#tpu.dimension_semantics<parallel>], iteration_bounds = array<i64: 1>, scalar_prefetch = 0 : i64, scratch_operands = 0 : i64, tpu.core_type = #tpu.core_type<tc>, window_params = [{transform_indices = @transform_0, window_bounds = array<i64: 16, 512>}, {pipeline_mode = #tpu.pipeline_mode<synchronous>, transform_indices = @transform_1, window_bounds = array<i64: 512, 512>}, {pipeline_mode = #tpu.pipeline_mode<synchronous>, transform_indices = @transform_2, window_bounds = array<i64: 1, 512>}, {pipeline_mode = #tpu.pipeline_mode<synchronous>, transform_indices = @transform_3, window_bounds = array<i64: 512, 512>}, {pipeline_mode = #tpu.pipeline_mode<synchronous>, transform_indices = @transform_4, window_bounds = array<i64: 1, 512>}, {pipeline_mode = #tpu.pipeline_mode<synchronous>, transform_indices = @transform_5, window_bounds = array<i64: 512, 512>}, {pipeline_mode = #tpu.pipeline_mode<synchronous>, transform_indices = @transform_6, window_bounds = array<i64: 1, 512>}, {pipeline_mode = #tpu.pipeline_mode<synchronous>, transform_indices = @transform_7, window_bounds = array<i64: 512, 256>}, {pipeline_mode = #tpu.pipeline_mode<synchronous>, transform_indices = @transform_8, window_bounds = array<i64: 1, 256>}, {transform_indices = @transform_9, window_bounds = array<i64: 16, 256>}]} {
    %c0 = arith.constant 0 : index
    %c0_0 = arith.constant 0 : index
    %0 = vector.load %arg1[%c0, %c0_0] : memref<16x512xbf16, #tpu.memory_space<vmem>>, vector<16x512xbf16>
    %c0_1 = arith.constant 0 : index
    %c0_2 = arith.constant 0 : index
    %1 = vector.load %arg2[%c0_1, %c0_2] : memref<512x512xbf16, #tpu.memory_space<vmem>>, vector<512x512xbf16>
    %cst = arith.constant dense<0.000000e+00> : vector<16x512xf32>
    %2 = tpu.matmul %0, %1, %cst {dimension_numbers = #tpu.dot_dimension_numbers<[1], [0], [0], [1], [0, 0, 1, 1], [], []>} : vector<16x512xbf16>, vector<512x512xbf16>, vector<16x512xf32> -> vector<16x512xf32>
    %c0_3 = arith.constant 0 : index
    %c0_4 = arith.constant 0 : index
    %3 = vector.load %arg3[%c0_3, %c0_4] : memref<1x512xf32, #tpu.memory_space<vmem>>, vector<1x512xf32>
    %4 = vector.broadcast %3 : vector<1x512xf32> to vector<16x512xf32>
    %5 = arith.addf %2, %4 : vector<16x512xf32>
    %cst_5 = arith.constant 0.000000e+00 : f32
    %6 = vector.broadcast %cst_5 : f32 to vector<16x512xf32>
    %7 = arith.maximumf %5, %6 : vector<16x512xf32>
    %8 = arith.truncf %7 : vector<16x512xf32> to vector<16x512xbf16>
    %c0_6 = arith.constant 0 : index
    %c0_7 = arith.constant 0 : index
    %9 = vector.load %arg4[%c0_6, %c0_7] : memref<512x512xbf16, #tpu.memory_space<vmem>>, vector<512x512xbf16>
    %cst_8 = arith.constant dense<0.000000e+00> : vector<16x512xf32>
    %10 = tpu.matmul %8, %9, %cst_8 {dimension_numbers = #tpu.dot_dimension_numbers<[1], [0], [0], [1], [0, 0, 1, 1], [], []>} : vector<16x512xbf16>, vector<512x512xbf16>, vector<16x512xf32> -> vector<16x512xf32>
    %c0_9 = arith.constant 0 : index
    %c0_10 = arith.constant 0 : index
    %11 = vector.load %arg5[%c0_9, %c0_10] : memref<1x512xf32, #tpu.memory_space<vmem>>, vector<1x512xf32>
    %12 = vector.broadcast %11 : vector<1x512xf32> to vector<16x512xf32>
    %13 = arith.addf %10, %12 : vector<16x512xf32>
    %cst_11 = arith.constant 0.000000e+00 : f32
    %14 = vector.broadcast %cst_11 : f32 to vector<16x512xf32>
    %15 = arith.maximumf %13, %14 : vector<16x512xf32>
    %16 = arith.truncf %15 : vector<16x512xf32> to vector<16x512xbf16>
    %c0_12 = arith.constant 0 : index
    %c0_13 = arith.constant 0 : index
    %17 = vector.load %arg6[%c0_12, %c0_13] : memref<512x512xbf16, #tpu.memory_space<vmem>>, vector<512x512xbf16>
    %cst_14 = arith.constant dense<0.000000e+00> : vector<16x512xf32>
    %18 = tpu.matmul %16, %17, %cst_14 {dimension_numbers = #tpu.dot_dimension_numbers<[1], [0], [0], [1], [0, 0, 1, 1], [], []>} : vector<16x512xbf16>, vector<512x512xbf16>, vector<16x512xf32> -> vector<16x512xf32>
    %c0_15 = arith.constant 0 : index
    %c0_16 = arith.constant 0 : index
    %19 = vector.load %arg7[%c0_15, %c0_16] : memref<1x512xf32, #tpu.memory_space<vmem>>, vector<1x512xf32>
    %20 = vector.broadcast %19 : vector<1x512xf32> to vector<16x512xf32>
    %21 = arith.addf %18, %20 : vector<16x512xf32>
    %cst_17 = arith.constant 0.000000e+00 : f32
    %22 = vector.broadcast %cst_17 : f32 to vector<16x512xf32>
    %23 = arith.maximumf %21, %22 : vector<16x512xf32>
    %24 = arith.truncf %23 : vector<16x512xf32> to vector<16x512xbf16>
    %c0_18 = arith.constant 0 : index
    %c0_19 = arith.constant 0 : index
    %25 = vector.load %arg8[%c0_18, %c0_19] : memref<512x256xbf16, #tpu.memory_space<vmem>>, vector<512x256xbf16>
    %cst_20 = arith.constant dense<0.000000e+00> : vector<16x256xf32>
    %26 = tpu.matmul %24, %25, %cst_20 {dimension_numbers = #tpu.dot_dimension_numbers<[1], [0], [0], [1], [0, 0, 1, 1], [], []>} : vector<16x512xbf16>, vector<512x256xbf16>, vector<16x256xf32> -> vector<16x256xf32>
    %c0_21 = arith.constant 0 : index
    %c0_22 = arith.constant 0 : index
    %27 = vector.load %arg9[%c0_21, %c0_22] : memref<1x256xf32, #tpu.memory_space<vmem>>, vector<1x256xf32>
    %28 = vector.broadcast %27 : vector<1x256xf32> to vector<16x256xf32>
    %29 = arith.addf %26, %28 : vector<16x256xf32>
    %cst_23 = arith.constant 0.000000e+00 : f32
    %30 = vector.broadcast %cst_23 : f32 to vector<16x256xf32>
    %31 = arith.maximumf %29, %30 : vector<16x256xf32>
    %c0_24 = arith.constant 0 : index
    %c0_25 = arith.constant 0 : index
    %32 = vector.load %arg10[%c0_24, %c0_25] : memref<16x256xf32, #tpu.memory_space<vmem>>, vector<16x256xf32>
    tpu.vector_store %arg10[%c0_24, %c0_25], %31 {strides = array<i32>} : memref<16x256xf32, #tpu.memory_space<vmem>>, vector<16x256xf32>,
    return
  }
  func.func @transform_0(%arg0: i32) -> (i32, i32) {
    %c0_i32 = arith.constant 0 : i32
    %c0_i32_0 = arith.constant 0 : i32
    return %arg0, %c0_i32 : i32, i32
  }
  func.func @transform_1(%arg0: i32) -> (i32, i32) {
    %c0_i32 = arith.constant 0 : i32
    %c0_i32_0 = arith.constant 0 : i32
    %c0_i32_1 = arith.constant 0 : i32
    return %c0_i32, %c0_i32_0 : i32, i32
  }
  func.func @transform_2(%arg0: i32) -> (i32, i32) {
    %c0_i32 = arith.constant 0 : i32
    %c0_i32_0 = arith.constant 0 : i32
    %c0_i32_1 = arith.constant 0 : i32
    return %c0_i32, %c0_i32_0 : i32, i32
  }
  func.func @transform_3(%arg0: i32) -> (i32, i32) {
    %c0_i32 = arith.constant 0 : i32
    %c0_i32_0 = arith.constant 0 : i32
    %c0_i32_1 = arith.constant 0 : i32
    return %c0_i32, %c0_i32_0 : i32, i32
  }
  func.func @transform_4(%arg0: i32) -> (i32, i32) {
    %c0_i32 = arith.constant 0 : i32
    %c0_i32_0 = arith.constant 0 : i32
    %c0_i32_1 = arith.constant 0 : i32
    return %c0_i32, %c0_i32_0 : i32, i32
  }
  func.func @transform_5(%arg0: i32) -> (i32, i32) {
    %c0_i32 = arith.constant 0 : i32
    %c0_i32_0 = arith.constant 0 : i32
    %c0_i32_1 = arith.constant 0 : i32
    return %c0_i32, %c0_i32_0 : i32, i32
  }
  func.func @transform_6(%arg0: i32) -> (i32, i32) {
    %c0_i32 = arith.constant 0 : i32
    %c0_i32_0 = arith.constant 0 : i32
    %c0_i32_1 = arith.constant 0 : i32
    return %c0_i32, %c0_i32_0 : i32, i32
  }
  func.func @transform_7(%arg0: i32) -> (i32, i32) {
    %c0_i32 = arith.constant 0 : i32
    %c0_i32_0 = arith.constant 0 : i32
    %c0_i32_1 = arith.constant 0 : i32
    return %c0_i32, %c0_i32_0 : i32, i32
  }
  func.func @transform_8(%arg0: i32) -> (i32, i32) {
    %c0_i32 = arith.constant 0 : i32
    %c0_i32_0 = arith.constant 0 : i32
    %c0_i32_1 = arith.constant 0 : i32
    return %c0_i32, %c0_i32_0 : i32, i32
  }
  func.func @transform_9(%arg0: i32) -> (i32, i32) {
    %c0_i32 = arith.constant 0 : i32
    %c0_i32_0 = arith.constant 0 : i32
    return %arg0, %c0_i32 : i32, i32
  }
}

</mosaic_0001>

<bundles_post_ra>
// kernel: _relation_pallas.1
= control target key start
LH: loop header
LB: loop body
LE: loop exit
PB: predicated region body
PF: predicated region fallthrough
CT: control target
= control target key end

     0   :  { %14 = vsyncpa [#allocation3], 0  ;;  %s5118_s0 = inlined_call_operand.hbm [shape: bf16[16,512], index: 0, kind: input, shape index: {}]   ;;  %s5119_s1 = inlined_call_operand.hbm [shape: bf16[512,512], index: 1, kind: input, shape index: {}]   ;;  %s5120_s2 = inlined_call_operand.vmem [shape: f32[1,512], index: 2, kind: input, shape index: {}]   ;;  %s5121_s3 = inlined_call_operand.hbm [shape: bf16[512,512], index: 3, kind: input, shape index: {}]   ;;  %s5122_s4 = inlined_call_operand.vmem [shape: f32[1,512], index: 4, kind: input, shape index: {}]   ;;  %s5123_s5 = inlined_call_operand.hbm [shape: bf16[512,512], index: 5, kind: input, shape index: {}]   ;;  %s5124_s6 = inlined_call_operand.vmem [shape: f32[1,512], index: 6, kind: input, shape index: {}]   ;;  %s5125_s7 = inlined_call_operand.hbm [shape: bf16[512,256], index: 7, kind: input, shape index: {}]   ;;  %s5126_s8 = inlined_call_operand.vmem [shape: f32[1,256], index: 8, kind: input, shape index: {}]   ;;  %s5127_s9 = inlined_call_operand.hbm [shape: f32[16,256], index: 9, kind: output, shape index: {}]  }
   0x1   :  { %15 = vsyncpa [#allocation6], 0 }
   0x2   :  { %16 = vsyncpa [#allocation9], 0 }
   0x3   :  { %17 = vsyncpa [#allocation4], 0  ;;  %s4892_s30 = smov [#allocation5]   ;;  %s4893_s11 = smov [#allocation8]  }
   0x4   :  { %s35_s10 = sshll.u32 %s4892_s30, 4  ;;  %s63_s12 = sshll.u32 %s4893_s11, 4  ;;  %s36_s10 = int_to_ptr.vmem [resolvable:$true] %s35_s10  ;;  %s4952_s12 = int_to_ptr.vmem [resolvable:$true] %s63_s12 }
   0x5   :  { %s4752_s15 = scalar_lea.hbm %s5119_s1, 16384 }
   0x6   :  { %p4753_p0 = scmp.ne.s32.totalorder %s5119_s1, %s4752_s15  ;;  %p4756_p1 = scmp.lt.u32.totalorder %s4752_s15, %s5119_s1 }
   0x8   :  { %p4758_p2 = pnand %p4756_p1, %p4753_p0 }
   0xa   :  { %4761 = shalt.err (!%p4758_p2)
}
   0xb   :  { %s4762_s20 = scalar_lea.vmem %s36_s10, 16384  ;;  %p4767_p4 = scmp.lt.s32.totalorder %s36_s10, %s36_s10 }
   0xc   :  { %p4763_p3 = scmp.ne.s32.totalorder %s36_s10, %s4762_s20  ;;  %p4768_p5 = scmp.lt.s32.totalorder %s4762_s20, %s4762_s20 }
   0xe   :  { %p4769_p6 = por %p4768_p5, %p4767_p4 }
  0x10   :  { %p4770_p7 = pnand %p4769_p6, %p4763_p3 }
  0x12   :  { %4773 = shalt.err (!%p4770_p7)
}
  0x13   :  { %s4894_s21 = smov 256   ;;  %s4895_s22 = smov 16  }
  0x14   :  { %41 = dma.hbm_to_vmem [thread:$0]  %s5119_s1, 16384, %s36_s10, [#allocation6], %s4894_s21, %s4894_s21, %s4895_s22  }
  0x15   :  { %s4774_s27 = scalar_lea.hbm %s5123_s5, 16384 }
  0x16   :  { %p4775_p8 = scmp.ne.s32.totalorder %s5123_s5, %s4774_s27  ;;  %p4778_p9 = scmp.lt.u32.totalorder %s4774_s27, %s5123_s5 }
  0x18   :  { %p4780_p10 = pnand %p4778_p9, %p4775_p8 }
  0x1a   :  { %4783 = shalt.err (!%p4780_p10)
}
  0x1b   :  { %s4784_s13 = scalar_lea.vmem %s4952_s12, 16384  ;;  %p4789_p12 = scmp.lt.s32.totalorder %s4952_s12, %s4952_s12 }
  0x1c   :  { %p4785_p11 = scmp.ne.s32.totalorder %s4952_s12, %s4784_s13  ;;  %p4790_p13 = scmp.lt.s32.totalorder %s4784_s13, %s4784_s13 }
  0x1e   :  { %p4791_p0 = por %p4790_p13, %p4789_p12 }
  0x20   :  { %p4792_p1 = pnand %p4791_p0, %p4785_p11 }
  0x22   :  { %4795 = shalt.err (!%p4792_p1)
}
  0x23   :  { %69 = dma.hbm_to_vmem [thread:$0]  %s5123_s5, 16384, %s4952_s12, [#allocation9], %s4894_s21, %s4894_s21, %s4895_s22  }
  0x24   :  { %s4896_s14 = smov [#allocation2]   ;;  %s4897_s16 = smov [#allocation7]  }
  0x25   :  { %s23_s15 = sshll.u32 %s4896_s14, 4  ;;  %s49_s17 = sshll.u32 %s4897_s16, 4  ;;  %s24_s15 = int_to_ptr.vmem [resolvable:$true] %s23_s15  ;;  %s4989_s17 = int_to_ptr.vmem [resolvable:$true] %s49_s17 }
  0x26   :  { %s4796_s20 = scalar_lea.hbm %s5118_s0, 512 }
  0x27   :  { %p4797_p2 = scmp.ne.s32.totalorder %s5118_s0, %s4796_s20  ;;  %p4800_p3 = scmp.lt.u32.totalorder %s4796_s20, %s5118_s0 }
  0x29   :  { %p4802_p4 = pnand %p4800_p3, %p4797_p2 }
  0x2b   :  { %4805 = shalt.err (!%p4802_p4)
}
  0x2c   :  { %s4806_s5 = scalar_lea.vmem %s24_s15, 512  ;;  %p4811_p6 = scmp.lt.s32.totalorder %s24_s15, %s24_s15 }
  0x2d   :  { %p4807_p5 = scmp.ne.s32.totalorder %s24_s15, %s4806_s5  ;;  %p4812_p7 = scmp.lt.s32.totalorder %s4806_s5, %s4806_s5 }
  0x2f   :  { %p4813_p8 = por %p4812_p7, %p4811_p6 }
  0x31   :  { %p4814_p9 = pnand %p4813_p8, %p4807_p5 }
  0x33   :  { %4817 = shalt.err (!%p4814_p9)
}
  0x34   :  { %29 = dma.hbm_to_vmem [thread:$0]  %s5118_s0, 512, %s24_s15, [#allocation3], %s4894_s21, %s4894_s21, %s4895_s22  }
  0x35   :  { %s4818_s30 = scalar_lea.hbm %s5121_s3, 16384 }
  0x36   :  { %p4819_p10 = scmp.ne.s32.totalorder %s5121_s3, %s4818_s30  ;;  %p4822_p11 = scmp.lt.u32.totalorder %s4818_s30, %s5121_s3 }
  0x38   :  { %p4824_p12 = pnand %p4822_p11, %p4819_p10 }
  0x3a   :  { %4827 = shalt.err (!%p4824_p12)
}
  0x3b   :  { %s4828_s14 = scalar_lea.vmem %s4989_s17, 16384  ;;  %p4833_p0 = scmp.lt.s32.totalorder %s4989_s17, %s4989_s17 }
  0x3c   :  { %p4829_p13 = scmp.ne.s32.totalorder %s4989_s17, %s4828_s14  ;;  %p4834_p1 = scmp.lt.s32.totalorder %s4828_s14, %s4828_s14 }
  0x3e   :  { %p4835_p2 = por %p4834_p1, %p4833_p0 }
  0x40   :  { %p4836_p3 = pnand %p4835_p2, %p4829_p13 }
  0x42   :  { %4839 = shalt.err (!%p4836_p3)
}
  0x43   :  { %55 = dma.hbm_to_vmem [thread:$0]  %s5121_s3, 16384, %s4989_s17, [#allocation6], %s4894_s21, %s4894_s21, %s4895_s22  }
  0x44   :  { %s4898_s16 = smov [#allocation10]   ;;  %s4840_s23 = scalar_lea.hbm %s5125_s7, 8192 }
  0x45   :  { %s77_s18 = sshll.u32 %s4898_s16, 4  ;;  %p4841_p4 = scmp.ne.s32.totalorder %s5125_s7, %s4840_s23  ;;  %s78_s18 = int_to_ptr.vmem [resolvable:$true] %s77_s18 }
  0x46   :  { %p4844_p5 = scmp.lt.u32.totalorder %s4840_s23, %s5125_s7 }
  0x48   :  { %p4846_p6 = pnand %p4844_p5, %p4841_p4 }
  0x4a   :  { %4849 = shalt.err (!%p4846_p6)
}
  0x4b   :  { %s4850_s12 = scalar_lea.vmem %s78_s18, 8192  ;;  %p4855_p8 = scmp.lt.s32.totalorder %s78_s18, %s78_s18 }
  0x4c   :  { %p4851_p7 = scmp.ne.s32.totalorder %s78_s18, %s4850_s12  ;;  %p4856_p9 = scmp.lt.s32.totalorder %s4850_s12, %s4850_s12 }
  0x4e   :  { %p4857_p10 = por %p4856_p9, %p4855_p8 }
  0x50   :  { %p4858_p11 = pnand %p4857_p10, %p4851_p7 }
  0x52   :  { %4861 = shalt.err (!%p4858_p11)
}
  0x53   :  { %s4899_s3 = smov 128   ;;  %s4900_s17 = smov 8  }
  0x54   :  { %83 = dma.hbm_to_vmem [thread:$0]  %s5125_s7, 8192, %s78_s18, [#allocation9], %s4899_s3, %s4899_s3, %s4900_s17  }
  0x55   :  { %4884 = dma.done.wait [#allocation3], 512  }
  0x56   :  { %4885 = vsyncadd [#allocation3], 4294966784 }
  0x57   :  { %4886 = dma.done.wait [#allocation6], 32768  }
  0x58   :  { %4887 = vsyncadd [#allocation6], 4294934528 }
  0x59   :  { %4888 = dma.done.wait [#allocation9], 24576  }
  0x5a   :  { %4889 = vsyncadd [#allocation9], 4294942720  ;;  %v4074_v0 = vld [vmem:[#allocation5 + $0x4] ss:$16 sps:$4 sm:$0xff]   ;;  %v4076_v1 = vld [vmem:[#allocation5] ss:$16 sps:$4 sm:$0xff]  }
  0x5b   :  { %915 = vmatprep.subr.bf16.mxu1 %v4074_v0  ;;  %v4077_v2 = vld [vmem:[#allocation5 + $0x204] ss:$16 sps:$4 sm:$0xff]   ;;  %v4079_v3 = vld [vmem:[#allocation5 + $0x200] ss:$16 sps:$4 sm:$0xff]   ;;  %v5038_v51 = vld [vmem:[#allocation2 + $0xc] ss:$16 sps:$4 sm:$0xff]  }
  0x5c   :  { %916 = vmatpush1.bf16.msra.mxu1 %v4076_v1  ;;  %v4080_v4 = vld [vmem:[#allocation5 + $0x24] ss:$16 sps:$4 sm:$0xff]   ;;  %v4082_v5 = vld [vmem:[#allocation5 + $0x20] ss:$16 sps:$4 sm:$0xff]   ;;  %958 = vmatprep.subr.bf16.mxu0 %v4077_v2  ;;  %v4175_v1 = vld [vmem:[#allocation5 + $0xc] ss:$16 sps:$4 sm:$0xff]  }
  0x5d   :  { %v4083_v6 = vld [vmem:[#allocation5 + $0x224] ss:$16 sps:$4 sm:$0xff]   ;;  %959 = vmatpush1.bf16.msra.mxu0 %v4079_v3  ;;  %917 = vmatprep.subr.bf16.mxu1 %v4080_v4  ;;  %v4085_v7 = vld [vmem:[#allocation5 + $0x220] ss:$16 sps:$4 sm:$0xff]   ;;  %v4173_v4 = vld [vmem:[#allocation5 + $0x8] ss:$16 sps:$4 sm:$0xff]  }
  0x5e   :  { %960 = vmatprep.subr.bf16.mxu0 %v4083_v6  ;;  %v4086_v8 = vld [vmem:[#allocation5 + $0x44] ss:$16 sps:$4 sm:$0xff]   ;;  %v4088_v9 = vld [vmem:[#allocation5 + $0x40] ss:$16 sps:$4 sm:$0xff]   ;;  %990 = vmatprep.mubr.bf16.mxu0 %v5038_v51  ;;  %v4181_v6 = vld [vmem:[#allocation5 + $0x2c] ss:$16 sps:$4 sm:$0xff]  }
  0x5f   :  { %v4089_v10 = vld [vmem:[#allocation5 + $0x244] ss:$16 sps:$4 sm:$0xff]   ;;  %v4091_v12 = vld [vmem:[#allocation5 + $0x240] ss:$16 sps:$4 sm:$0xff]   ;;  %s4901_s1 = smov [#allocation11]  }
  0x60   :  { %918 = vmatpush1.bf16.msra.mxu1 %v4082_v5  ;;  %v4092_v11 = vld [vmem:[#allocation5 + $0x64] ss:$16 sps:$4 sm:$0xff]   ;;  %v4094_v14 = vld [vmem:[#allocation5 + $0x60] ss:$16 sps:$4 sm:$0xff]   ;;  %v5043_v5 = vld [vmem:[#allocation2 + $0x8] ss:$16 sps:$4 sm:$0xff]  }
  0x61   :  { %919 = vmatprep.subr.bf16.mxu1 %v4086_v8  ;;  %961 = vmatpush1.bf16.msra.mxu0 %v4085_v7  ;;  %v4095_v13 = vld [vmem:[#allocation5 + $0x264] ss:$16 sps:$4 sm:$0xff]   ;;  %v4097_v16 = vld [vmem:[#allocation5 + $0x260] ss:$16 sps:$4 sm:$0xff]   ;;  %v4179_v7 = vld [vmem:[#allocation5 + $0x28] ss:$16 sps:$4 sm:$0xff]  }
  0x62   :  { %962 = vmatprep.subr.bf16.mxu0 %v4089_v10  ;;  %v4098_v15 = vld [vmem:[#allocation5 + $0x84] ss:$16 sps:$4 sm:$0xff]   ;;  %v4100_v18 = vld [vmem:[#allocation5 + $0x80] ss:$16 sps:$4 sm:$0xff]   ;;  %v4184_v8 = vld [vmem:[#allocation5 + $0x4c] ss:$16 sps:$4 sm:$0xff]  }
  0x63   :  { %v4101_v17 = vld [vmem:[#allocation5 + $0x284] ss:$16 sps:$4 sm:$0xff]   ;;  %v4103_v20 = vld [vmem:[#allocation5 + $0x280] ss:$16 sps:$4 sm:$0xff]   ;;  %v4187_v10 = vld [vmem:[#allocation5 + $0x6c] ss:$16 sps:$4 sm:$0xff]  }
  0x64   :  { %920 = vmatpush1.bf16.msra.mxu1 %v4088_v9  ;;  %v4104_v19 = vld [vmem:[#allocation5 + $0xa4] ss:$16 sps:$4 sm:$0xff]   ;;  %v4106_v22 = vld [vmem:[#allocation5 + $0xa0] ss:$16 sps:$4 sm:$0xff]   ;;  %v4182_v9 = vld [vmem:[#allocation5 + $0x48] ss:$16 sps:$4 sm:$0xff]  }
  0x65   :  { %921 = vmatprep.subr.bf16.mxu1 %v4092_v11  ;;  %963 = vmatpush1.bf16.msra.mxu0 %v4091_v12  ;;  %v4107_v21 = vld [vmem:[#allocation5 + $0x2a4] ss:$16 sps:$4 sm:$0xff]   ;;  %v4109_v24 = vld [vmem:[#allocation5 + $0x2a0] ss:$16 sps:$4 sm:$0xff]   ;;  %v4185_v11 = vld [vmem:[#allocation5 + $0x68] ss:$16 sps:$4 sm:$0xff]  }
  0x66   :  { %964 = vmatprep.subr.bf16.mxu0 %v4095_v13  ;;  %v4110_v23 = vld [vmem:[#allocation5 + $0xc4] ss:$16 sps:$4 sm:$0xff]   ;;  %v4112_v26 = vld [vmem:[#allocation5 + $0xc0] ss:$16 sps:$4 sm:$0xff]   ;;  %v4190_v12 = vld [vmem:[#allocation5 + $0x8c] ss:$16 sps:$4 sm:$0xff]  }
  0x67   :  { %v4113_v25 = vld [vmem:[#allocation5 + $0x2c4] ss:$16 sps:$4 sm:$0xff]   ;;  %v4115_v28 = vld [vmem:[#allocation5 + $0x2c0] ss:$16 sps:$4 sm:$0xff]   ;;  %v4188_v13 = vld [vmem:[#allocation5 + $0x88] ss:$16 sps:$4 sm:$0xff]  }
  0x68   :  { %922 = vmatpush1.bf16.msra.mxu1 %v4094_v14  ;;  %v4116_v27 = vld [vmem:[#allocation5 + $0xe4] ss:$16 sps:$4 sm:$0xff]   ;;  %v4118_v30 = vld [vmem:[#allocation5 + $0xe0] ss:$16 sps:$4 sm:$0xff]   ;;  %v4193_v14 = vld [vmem:[#allocation5 + $0xac] ss:$16 sps:$4 sm:$0xff]  }
  0x69   :  { %923 = vmatprep.subr.bf16.mxu1 %v4098_v15  ;;  %965 = vmatpush1.bf16.msra.mxu0 %v4097_v16  ;;  %v4119_v29 = vld [vmem:[#allocation5 + $0x2e4] ss:$16 sps:$4 sm:$0xff]   ;;  %v4121_v32 = vld [vmem:[#allocation5 + $0x2e0] ss:$16 sps:$4 sm:$0xff]   ;;  %v4191_v15 = vld [vmem:[#allocation5 + $0xa8] ss:$16 sps:$4 sm:$0xff]  }
  0x6a   :  { %966 = vmatprep.subr.bf16.mxu0 %v4101_v17  ;;  %v4122_v31 = vld [vmem:[#allocation5 + $0x104] ss:$16 sps:$4 sm:$0xff]   ;;  %v4124_v34 = vld [vmem:[#allocation5 + $0x100] ss:$16 sps:$4 sm:$0xff]   ;;  %v4196_v16 = vld [vmem:[#allocation5 + $0xcc] ss:$16 sps:$4 sm:$0xff]  }
  0x6b   :  { %v4125_v33 = vld [vmem:[#allocation5 + $0x304] ss:$16 sps:$4 sm:$0xff]   ;;  %v4127_v36 = vld [vmem:[#allocation5 + $0x300] ss:$16 sps:$4 sm:$0xff]   ;;  %v4194_v17 = vld [vmem:[#allocation5 + $0xc8] ss:$16 sps:$4 sm:$0xff]  }
  0x6c   :  { %924 = vmatpush1.bf16.msra.mxu1 %v4100_v18  ;;  %v4128_v35 = vld [vmem:[#allocation5 + $0x124] ss:$16 sps:$4 sm:$0xff]   ;;  %v4130_v38 = vld [vmem:[#allocation5 + $0x120] ss:$16 sps:$4 sm:$0xff]   ;;  %v4199_v18 = vld [vmem:[#allocation5 + $0xec] ss:$16 sps:$4 sm:$0xff]  }
  0x6d   :  { %925 = vmatprep.subr.bf16.mxu1 %v4104_v19  ;;  %967 = vmatpush1.bf16.msra.mxu0 %v4103_v20  ;;  %v4131_v37 = vld [vmem:[#allocation5 + $0x324] ss:$16 sps:$4 sm:$0xff]   ;;  %v4133_v40 = vld [vmem:[#allocation5 + $0x320] ss:$16 sps:$4 sm:$0xff]   ;;  %s3542_s10 = sshll.u32 %s4901_s1, 4  ;;  %s3543_s10 = int_to_ptr.vmem [resolvable:$true] %s3542_s10 }
  0x6e   :  { %968 = vmatprep.subr.bf16.mxu0 %v4107_v21  ;;  %v4134_v39 = vld [vmem:[#allocation5 + $0x144] ss:$16 sps:$4 sm:$0xff]   ;;  %v4136_v42 = vld [vmem:[#allocation5 + $0x140] ss:$16 sps:$4 sm:$0xff]   ;;  %v4197_v21 = vld [vmem:[#allocation5 + $0xe8] ss:$16 sps:$4 sm:$0xff]   ;;  %p4867_p13 = scmp.lt.s32.totalorder %s3543_s10, %s3543_s10 }
  0x6f   :  { %v4137_v41 = vld [vmem:[#allocation5 + $0x344] ss:$16 sps:$4 sm:$0xff]   ;;  %v4139_v44 = vld [vmem:[#allocation5 + $0x340] ss:$16 sps:$4 sm:$0xff]  }
  0x70   :  { %926 = vmatpush1.bf16.msra.mxu1 %v4106_v22  ;;  %v4140_v43 = vld [vmem:[#allocation5 + $0x164] ss:$16 sps:$4 sm:$0xff]   ;;  %v4142_v46 = vld [vmem:[#allocation5 + $0x160] ss:$16 sps:$4 sm:$0xff]   ;;  %v4202_v22 = vld [vmem:[#allocation5 + $0x10c] ss:$16 sps:$4 sm:$0xff]  }
  0x71   :  { %927 = vmatprep.subr.bf16.mxu1 %v4110_v23  ;;  %969 = vmatpush1.bf16.msra.mxu0 %v4109_v24  ;;  %v4143_v45 = vld [vmem:[#allocation5 + $0x364] ss:$16 sps:$4 sm:$0xff]   ;;  %v4145_v49 = vld [vmem:[#allocation5 + $0x360] ss:$16 sps:$4 sm:$0xff]  }
  0x72   :  { %970 = vmatprep.subr.bf16.mxu0 %v4113_v25  ;;  %v4171_v47 = vld [vmem:[#allocation2 + $0x4] ss:$16 sps:$4 sm:$0xff]   ;;  %v4148_v52 = vld [vmem:[#allocation5 + $0x180] ss:$16 sps:$4 sm:$0xff]  }
  0x73   :  { %v4146_v48 = vld [vmem:[#allocation5 + $0x184] ss:$16 sps:$4 sm:$0xff]   ;;  %947 = vmatprep.mubr.bf16.mxu1 %v4171_v47  ;;  %v4151_v54 = vld [vmem:[#allocation5 + $0x380] ss:$16 sps:$4 sm:$0xff]  }
  0x74   :  { %928 = vmatpush1.bf16.msra.mxu1 %v4112_v26  ;;  %v4149_v50 = vld [vmem:[#allocation5 + $0x384] ss:$16 sps:$4 sm:$0xff]   ;;  %v4154_v56 = vld [vmem:[#allocation5 + $0x1a0] ss:$16 sps:$4 sm:$0xff]   ;;  %v4200_v26 = vld [vmem:[#allocation5 + $0x108] ss:$16 sps:$4 sm:$0xff]  }
  0x75   :  { %929 = vmatprep.subr.bf16.mxu1 %v4116_v27  ;;  %971 = vmatpush1.bf16.msra.mxu0 %v4115_v28  ;;  %v4152_v53 = vld [vmem:[#allocation5 + $0x1a4] ss:$16 sps:$4 sm:$0xff]   ;;  %v4157_v58 = vld [vmem:[#allocation5 + $0x3a0] ss:$16 sps:$4 sm:$0xff]   ;;  %v4205_v27 = vld [vmem:[#allocation5 + $0x12c] ss:$16 sps:$4 sm:$0xff]  }
  0x76   :  { %972 = vmatprep.subr.bf16.mxu0 %v4119_v29  ;;  %v4155_v55 = vld [vmem:[#allocation5 + $0x3a4] ss:$16 sps:$4 sm:$0xff]   ;;  %v4160_v60 = vld [vmem:[#allocation5 + $0x1c0] ss:$16 sps:$4 sm:$0xff]  }
  0x77   :  { %v4158_v57 = vld [vmem:[#allocation5 + $0x1c4] ss:$16 sps:$4 sm:$0xff]   ;;  %v4163_v62 = vld [vmem:[#allocation5 + $0x3c0] ss:$16 sps:$4 sm:$0xff]  }
  0x78   :  { %930 = vmatpush1.bf16.msra.mxu1 %v4118_v30  ;;  %v4161_v59 = vld [vmem:[#allocation5 + $0x3c4] ss:$16 sps:$4 sm:$0xff]   ;;  %v4166_v0 = vld [vmem:[#allocation5 + $0x1e0] ss:$16 sps:$4 sm:$0xff]   ;;  %v4203_v30 = vld [vmem:[#allocation5 + $0x128] ss:$16 sps:$4 sm:$0xff]  }
  0x79   :  { %931 = vmatprep.subr.bf16.mxu1 %v4122_v31  ;;  %973 = vmatpush1.bf16.msra.mxu0 %v4121_v32  ;;  %v4164_v61 = vld [vmem:[#allocation5 + $0x1e4] ss:$16 sps:$4 sm:$0xff]   ;;  %v4172_v2 = vld [vmem:[#allocation5 + $0x3e0] ss:$16 sps:$4 sm:$0xff]   ;;  %v4208_v31 = vld [vmem:[#allocation5 + $0x14c] ss:$16 sps:$4 sm:$0xff]  }
  0x7a   :  { %974 = vmatprep.subr.bf16.mxu0 %v4125_v33  ;;  %v4167_v63 = vld [vmem:[#allocation5 + $0x3e4] ss:$16 sps:$4 sm:$0xff]   ;;  %v5041_v3 = vld [vmem:[#allocation2] ss:$16 sps:$4 sm:$0xff]  }
  0x7b   :  { %v4272_v19 = vld [vmem:[#allocation7] ss:$16 sps:$4 sm:$0xff]   ;;  %v4274_v20 = vld [vmem:[#allocation7 + $0x4] ss:$16 sps:$4 sm:$0xff]  }
  0x7c   :  { %932 = vmatpush1.bf16.msra.mxu1 %v4124_v34  ;;  %v4280_v23 = vld [vmem:[#allocation7 + $0x24] ss:$16 sps:$4 sm:$0xff]   ;;  %v4278_v24 = vld [vmem:[#allocation7 + $0x20] ss:$16 sps:$4 sm:$0xff]   ;;  %v4206_v34 = vld [vmem:[#allocation5 + $0x148] ss:$16 sps:$4 sm:$0xff]  }
  0x7d   :  { %933 = vmatprep.subr.bf16.mxu1 %v4128_v35  ;;  %975 = vmatpush1.bf16.msra.mxu0 %v4127_v36  ;;  %v4286_v25 = vld [vmem:[#allocation7 + $0x44] ss:$16 sps:$4 sm:$0xff]   ;;  %v4284_v28 = vld [vmem:[#allocation7 + $0x40] ss:$16 sps:$4 sm:$0xff]   ;;  %v4211_v35 = vld [vmem:[#allocation5 + $0x16c] ss:$16 sps:$4 sm:$0xff]  }
  0x7e   :  { %976 = vmatprep.subr.bf16.mxu0 %v4131_v37  ;;  %v4292_v29 = vld [vmem:[#allocation7 + $0x64] ss:$16 sps:$4 sm:$0xff]   ;;  %v4290_v32 = vld [vmem:[#allocation7 + $0x60] ss:$16 sps:$4 sm:$0xff]  }
  0x7f   :  { %v4298_v33 = vld [vmem:[#allocation7 + $0x84] ss:$16 sps:$4 sm:$0xff]   ;;  %v4296_v36 = vld [vmem:[#allocation7 + $0x80] ss:$16 sps:$4 sm:$0xff]  }
  0x80   :  { %934 = vmatpush1.bf16.msra.mxu1 %v4130_v38  ;;  %v4304_v37 = vld [vmem:[#allocation7 + $0xa4] ss:$16 sps:$4 sm:$0xff]   ;;  %v4209_v38 = vld [vmem:[#allocation5 + $0x168] ss:$16 sps:$4 sm:$0xff]  }
  0x81   :  { %935 = vmatprep.subr.bf16.mxu1 %v4134_v39  ;;  %977 = vmatpush1.bf16.msra.mxu0 %v4133_v40  ;;  %v4214_v39 = vld [vmem:[#allocation5 + $0x18c] ss:$16 sps:$4 sm:$0xff]   ;;  %v4302_v40 = vld [vmem:[#allocation7 + $0xa0] ss:$16 sps:$4 sm:$0xff]  }
  0x82   :  { %978 = vmatprep.subr.bf16.mxu0 %v4137_v41  ;;  %v4310_v41 = vld [vmem:[#allocation7 + $0xc4] ss:$16 sps:$4 sm:$0xff]  }
  0x84   :  { %936 = vmatpush1.bf16.msra.mxu1 %v4136_v42  ;;  %v4212_v42 = vld [vmem:[#allocation5 + $0x188] ss:$16 sps:$4 sm:$0xff]  }
  0x85   :  { %937 = vmatprep.subr.bf16.mxu1 %v4140_v43  ;;  %979 = vmatpush1.bf16.msra.mxu0 %v4139_v44  ;;  %v4217_v43 = vld [vmem:[#allocation5 + $0x1ac] ss:$16 sps:$4 sm:$0xff]   ;;  %v4308_v44 = vld [vmem:[#allocation7 + $0xc0] ss:$16 sps:$4 sm:$0xff]  }
  0x86   :  { %980 = vmatprep.subr.bf16.mxu0 %v4143_v45  ;;  %v4316_v45 = vld [vmem:[#allocation7 + $0xe4] ss:$16 sps:$4 sm:$0xff]  }
  0x88   :  { %938 = vmatpush1.bf16.msra.mxu1 %v4142_v46  ;;  %v4215_v46 = vld [vmem:[#allocation5 + $0x1a8] ss:$16 sps:$4 sm:$0xff]  }
  0x89   :  { %939 = vmatprep.subr.bf16.mxu1 %v4146_v48  ;;  %981 = vmatpush1.bf16.msra.mxu0 %v4145_v49  ;;  %v4314_v48 = vld [vmem:[#allocation7 + $0xe0] ss:$16 sps:$4 sm:$0xff]   ;;  %v4322_v49 = vld [vmem:[#allocation7 + $0x104] ss:$16 sps:$4 sm:$0xff]  }
  0x8a   :  { %982 = vmatprep.subr.bf16.mxu0 %v4149_v50  ;;  %v4218_v50 = vld [vmem:[#allocation5 + $0x1c8] ss:$16 sps:$4 sm:$0xff]  }
  0x8c   :  { %940 = vmatpush1.bf16.msra.mxu1 %v4148_v52  ;;  %v4223_v52 = vld [vmem:[#allocation5 + $0x1ec] ss:$16 sps:$4 sm:$0xff]  }
  0x8d   :  { %941 = vmatprep.subr.bf16.mxu1 %v4152_v53  ;;  %983 = vmatpush1.bf16.msra.mxu0 %v4151_v54  ;;  %v4320_v53 = vld [vmem:[#allocation7 + $0x100] ss:$16 sps:$4 sm:$0xff]   ;;  %v4328_v54 = vld [vmem:[#allocation7 + $0x124] ss:$16 sps:$4 sm:$0xff]  }
  0x8e   :  { %984 = vmatprep.subr.bf16.mxu0 %v4155_v55  ;;  %v4221_v55 = vld [vmem:[#allocation5 + $0x1e8] ss:$16 sps:$4 sm:$0xff]  }
  0x90   :  { %942 = vmatpush1.bf16.msra.mxu1 %v4154_v56  ;;  %v4226_v56 = vld [vmem:[#allocation5 + $0x20c] ss:$16 sps:$4 sm:$0xff]  }
  0x91   :  { %943 = vmatprep.subr.bf16.mxu1 %v4158_v57  ;;  %985 = vmatpush1.bf16.msra.mxu0 %v4157_v58  ;;  %v4326_v57 = vld [vmem:[#allocation7 + $0x120] ss:$16 sps:$4 sm:$0xff]   ;;  %v4334_v58 = vld [vmem:[#allocation7 + $0x144] ss:$16 sps:$4 sm:$0xff]  }
  0x92   :  { %986 = vmatprep.subr.bf16.mxu0 %v4161_v59  ;;  %v4224_v59 = vld [vmem:[#allocation5 + $0x208] ss:$16 sps:$4 sm:$0xff]  }
  0x94   :  { %944 = vmatpush1.bf16.msra.mxu1 %v4160_v60  ;;  %v4229_v60 = vld [vmem:[#allocation5 + $0x22c] ss:$16 sps:$4 sm:$0xff]  }
  0x95   :  { %945 = vmatprep.subr.bf16.mxu1 %v4164_v61  ;;  %987 = vmatpush1.bf16.msra.mxu0 %v4163_v62  ;;  %v4332_v61 = vld [vmem:[#allocation7 + $0x140] ss:$16 sps:$4 sm:$0xff]   ;;  %v4340_v62 = vld [vmem:[#allocation7 + $0x164] ss:$16 sps:$4 sm:$0xff]  }
  0x96   :  { %988 = vmatprep.subr.bf16.mxu0 %v4167_v63  ;;  %v4227_v63 = vld [vmem:[#allocation5 + $0x228] ss:$16 sps:$4 sm:$0xff]  }
  0x98   :  { %946 = vmatpush1.bf16.msra.mxu1 %v4166_v0  ;;  %v4232_v0 = vld [vmem:[#allocation5 + $0x24c] ss:$16 sps:$4 sm:$0xff]  }
  0x99   :  { %1001 = vmatprep.subr.bf16.mxu1 %v4175_v1  ;;  %989 = vmatpush1.bf16.msra.mxu0 %v4172_v2  ;;  %v4338_v1 = vld [vmem:[#allocation7 + $0x160] ss:$16 sps:$4 sm:$0xff]   ;;  %v4346_v2 = vld [vmem:[#allocation7 + $0x184] ss:$16 sps:$4 sm:$0xff]  }
  0x9a   :  { %1889 = vmatprep.subr.bf16.mxu0 %v4274_v20  ;;  %v4364_v20 = vld [vmem:[#allocation7 + $0x1e4] ss:$16 sps:$4 sm:$0xff]  }
  0x9b   :  { %948 = vmatmul.mubr.bf16.vlgmr.msra.gmra.mrb[0].mxu1 %v5041_v3 }
  0x9c   :  { %1002 = vmatpush1.bf16.msra.mxu1 %v4173_v4  ;;  %1033 = vmatprep.mubr.bf16.mxu1 %v4171_v47  ;;  %v4220_v47 = vld [vmem:[#allocation5 + $0x1cc] ss:$16 sps:$4 sm:$0xff]   ;;  %v4230_v4 = vld [vmem:[#allocation5 + $0x248] ss:$16 sps:$4 sm:$0xff]  }
  0x9d   :  { %991 = vmatmul.mubr.bf16.vlgmr.msra.gmra.mrb[0].mxu0 %v5043_v5  ;;  %1003 = vmatprep.subr.bf16.mxu1 %v4181_v6  ;;  %v4235_v6 = vld [vmem:[#allocation5 + $0x26c] ss:$16 sps:$4 sm:$0xff]  }
  0x9e   :  { %1890 = vmatpush1.bf16.msra.mxu0 %v4272_v19  ;;  %v4250_v19 = vld [vmem:[#allocation5 + $0x30c] ss:$16 sps:$4 sm:$0xff]  }
  0x9f   :  { %1891 = vmatprep.subr.bf16.mxu0 %v4280_v23  ;;  %v4253_v23 = vld [vmem:[#allocation5 + $0x32c] ss:$16 sps:$4 sm:$0xff]  }
  0xa0   :  { %1004 = vmatpush1.bf16.msra.mxu1 %v4179_v7  ;;  %v4344_v7 = vld [vmem:[#allocation7 + $0x180] ss:$16 sps:$4 sm:$0xff]  }
  0xa1   :  { %1005 = vmatprep.subr.bf16.mxu1 %v4184_v8  ;;  %v4233_v8 = vld [vmem:[#allocation5 + $0x268] ss:$16 sps:$4 sm:$0xff]  }
  0xa2   :  { %1892 = vmatpush1.bf16.msra.mxu0 %v4278_v24  ;;  %v4370_v24 = vld [vmem:[#allocation7 + $0x204] ss:$16 sps:$4 sm:$0xff]  }
  0xa3   :  { %1893 = vmatprep.subr.bf16.mxu0 %v4286_v25  ;;  %v4251_v25 = vld [vmem:[#allocation5 + $0x328] ss:$16 sps:$4 sm:$0xff]  }
  0xa4   :  { %1006 = vmatpush1.bf16.msra.mxu1 %v4182_v9  ;;  %v4238_v9 = vld [vmem:[#allocation5 + $0x28c] ss:$16 sps:$4 sm:$0xff]  }
  0xa5   :  { %1007 = vmatprep.subr.bf16.mxu1 %v4187_v10  ;;  %v4241_v10 = vld [vmem:[#allocation5 + $0x2ac] ss:$16 sps:$4 sm:$0xff]  }
  0xa6   :  { %1894 = vmatpush1.bf16.msra.mxu0 %v4284_v28  ;;  %v4259_v28 = vld [vmem:[#allocation5 + $0x36c] ss:$16 sps:$4 sm:$0xff]  }
  0xa7   :  { %1895 = vmatprep.subr.bf16.mxu0 %v4292_v29  ;;  %v4257_v29 = vld [vmem:[#allocation5 + $0x368] ss:$16 sps:$4 sm:$0xff]  }
  0xa8   :  { %1008 = vmatpush1.bf16.msra.mxu1 %v4185_v11  ;;  %v4244_v11 = vld [vmem:[#allocation5 + $0x2cc] ss:$16 sps:$4 sm:$0xff]  }
  0xa9   :  { %1009 = vmatprep.subr.bf16.mxu1 %v4190_v12  ;;  %v4352_v12 = vld [vmem:[#allocation7 + $0x1a4] ss:$16 sps:$4 sm:$0xff]  }
  0xaa   :  { %1896 = vmatpush1.bf16.msra.mxu0 %v4290_v32  ;;  %v4265_v32 = vld [vmem:[#allocation5 + $0x3ac] ss:$16 sps:$4 sm:$0xff]  }
  0xab   :  { %1897 = vmatprep.subr.bf16.mxu0 %v4298_v33  ;;  %v4263_v33 = vld [vmem:[#allocation5 + $0x3a8] ss:$16 sps:$4 sm:$0xff]  }
  0xac   :  { %1010 = vmatpush1.bf16.msra.mxu1 %v4188_v13  ;;  %v4242_v13 = vld [vmem:[#allocation5 + $0x2c8] ss:$16 sps:$4 sm:$0xff]  }
  0xad   :  { %1011 = vmatprep.subr.bf16.mxu1 %v4193_v14  ;;  %v4350_v14 = vld [vmem:[#allocation7 + $0x1a0] ss:$16 sps:$4 sm:$0xff]  }
  0xae   :  { %1898 = vmatpush1.bf16.msra.mxu0 %v4296_v36  ;;  %v4271_v36 = vld [vmem:[#allocation5 + $0x3ec] ss:$16 sps:$4 sm:$0xff]  }
  0xaf   :  { %1899 = vmatprep.subr.bf16.mxu0 %v4304_v37  ;;  %v4269_v37 = vld [vmem:[#allocation5 + $0x3e8] ss:$16 sps:$4 sm:$0xff]  }
  0xb0   :  { %1012 = vmatpush1.bf16.msra.mxu1 %v4191_v15  ;;  %v4247_v15 = vld [vmem:[#allocation5 + $0x2ec] ss:$16 sps:$4 sm:$0xff]  }
  0xb1   :  { %1013 = vmatprep.subr.bf16.mxu1 %v4196_v16  ;;  %v4358_v16 = vld [vmem:[#allocation7 + $0x1c4] ss:$16 sps:$4 sm:$0xff]  }
  0xb2   :  { %1900 = vmatpush1.bf16.msra.mxu0 %v4302_v40  ;;  %v4283_v40 = vld [vmem:[#allocation7 + $0x2c] ss:$16 sps:$4 sm:$0xff]  }
  0xb3   :  { %1901 = vmatprep.subr.bf16.mxu0 %v4310_v41  ;;  %v4281_v41 = vld [vmem:[#allocation7 + $0x28] ss:$16 sps:$4 sm:$0xff]  }
  0xb4   :  { %1014 = vmatpush1.bf16.msra.mxu1 %v4194_v17  ;;  %v4245_v17 = vld [vmem:[#allocation5 + $0x2e8] ss:$16 sps:$4 sm:$0xff]  }
  0xb5   :  { %1015 = vmatprep.subr.bf16.mxu1 %v4199_v18  ;;  %v4356_v18 = vld [vmem:[#allocation7 + $0x1c0] ss:$16 sps:$4 sm:$0xff]  }
  0xb6   :  { %1902 = vmatpush1.bf16.msra.mxu0 %v4308_v44  ;;  %v4295_v44 = vld [vmem:[#allocation7 + $0x6c] ss:$16 sps:$4 sm:$0xff]  }
  0xb7   :  { %1903 = vmatprep.subr.bf16.mxu0 %v4316_v45  ;;  %v4293_v45 = vld [vmem:[#allocation7 + $0x68] ss:$16 sps:$4 sm:$0xff]  }
  0xb8   :  { %1016 = vmatpush1.bf16.msra.mxu1 %v4197_v21  ;;  %v4248_v21 = vld [vmem:[#allocation5 + $0x308] ss:$16 sps:$4 sm:$0xff]  }
  0xb9   :  { %1017 = vmatprep.subr.bf16.mxu1 %v4202_v22  ;;  %v4362_v22 = vld [vmem:[#allocation7 + $0x1e0] ss:$16 sps:$4 sm:$0xff]  }
  0xba   :  { %1904 = vmatpush1.bf16.msra.mxu0 %v4314_v48  ;;  %v4307_v48 = vld [vmem:[#allocation7 + $0xac] ss:$16 sps:$4 sm:$0xff]  }
  0xbb   :  { %1905 = vmatprep.subr.bf16.mxu0 %v4322_v49  ;;  %v4305_v49 = vld [vmem:[#allocation7 + $0xa8] ss:$16 sps:$4 sm:$0xff]  }
  0xbc   :  { %1018 = vmatpush1.bf16.msra.mxu1 %v4200_v26  ;;  %v4256_v26 = vld [vmem:[#allocation5 + $0x34c] ss:$16 sps:$4 sm:$0xff]  }
  0xbd   :  { %1019 = vmatprep.subr.bf16.mxu1 %v4205_v27  ;;  %v4254_v27 = vld [vmem:[#allocation5 + $0x348] ss:$16 sps:$4 sm:$0xff]  }
  0xbe   :  { %1906 = vmatpush1.bf16.msra.mxu0 %v4320_v53  ;;  %v4317_v53 = vld [vmem:[#allocation7 + $0xe8] ss:$16 sps:$4 sm:$0xff]  }
  0xbf   :  { %1907 = vmatprep.subr.bf16.mxu0 %v4328_v54  ;;  %v4325_v54 = vld [vmem:[#allocation7 + $0x10c] ss:$16 sps:$4 sm:$0xff]  }
  0xc0   :  { %1020 = vmatpush1.bf16.msra.mxu1 %v4203_v30  ;;  %v4262_v30 = vld [vmem:[#allocation5 + $0x38c] ss:$16 sps:$4 sm:$0xff]  }
  0xc1   :  { %1021 = vmatprep.subr.bf16.mxu1 %v4208_v31  ;;  %v4260_v31 = vld [vmem:[#allocation5 + $0x388] ss:$16 sps:$4 sm:$0xff]  }
  0xc2   :  { %1908 = vmatpush1.bf16.msra.mxu0 %v4326_v57  ;;  %v4329_v57 = vld [vmem:[#allocation7 + $0x128] ss:$16 sps:$4 sm:$0xff]  }
  0xc3   :  { %1909 = vmatprep.subr.bf16.mxu0 %v4334_v58  ;;  %v4337_v58 = vld [vmem:[#allocation7 + $0x14c] ss:$16 sps:$4 sm:$0xff]  }
  0xc4   :  { %1022 = vmatpush1.bf16.msra.mxu1 %v4206_v34  ;;  %v4268_v34 = vld [vmem:[#allocation5 + $0x3cc] ss:$16 sps:$4 sm:$0xff]  }
  0xc5   :  { %1023 = vmatprep.subr.bf16.mxu1 %v4211_v35  ;;  %v4266_v35 = vld [vmem:[#allocation5 + $0x3c8] ss:$16 sps:$4 sm:$0xff]  }
  0xc6   :  { %1910 = vmatpush1.bf16.msra.mxu0 %v4332_v61  ;;  %v4341_v61 = vld [vmem:[#allocation7 + $0x168] ss:$16 sps:$4 sm:$0xff]  }
  0xc7   :  { %1911 = vmatprep.subr.bf16.mxu0 %v4340_v62  ;;  %v4349_v62 = vld [vmem:[#allocation7 + $0x18c] ss:$16 sps:$4 sm:$0xff]  }
  0xc8   :  { %1024 = vmatpush1.bf16.msra.mxu1 %v4209_v38  ;;  %v4277_v38 = vld [vmem:[#allocation7 + $0xc] ss:$16 sps:$4 sm:$0xff]  }
  0xc9   :  { %1025 = vmatprep.subr.bf16.mxu1 %v4214_v39  ;;  %v4275_v39 = vld [vmem:[#allocation7 + $0x8] ss:$16 sps:$4 sm:$0xff]  }
  0xca   :  { %1912 = vmatpush1.bf16.msra.mxu0 %v4338_v1  ;;  %v4353_v1 = vld [vmem:[#allocation7 + $0x1a8] ss:$16 sps:$4 sm:$0xff]  }
  0xcb   :  { %1913 = vmatprep.subr.bf16.mxu0 %v4346_v2  ;;  %v4361_v2 = vld [vmem:[#allocation7 + $0x1cc] ss:$16 sps:$4 sm:$0xff]  }
  0xcc   :  { %1026 = vmatpush1.bf16.msra.mxu1 %v4212_v42  ;;  %v4289_v42 = vld [vmem:[#allocation7 + $0x4c] ss:$16 sps:$4 sm:$0xff]  }
  0xcd   :  { %1027 = vmatprep.subr.bf16.mxu1 %v4217_v43  ;;  %v4287_v43 = vld [vmem:[#allocation7 + $0x48] ss:$16 sps:$4 sm:$0xff]  }
  0xce   :  { %1914 = vmatpush1.bf16.msra.mxu0 %v4344_v7  ;;  %v4365_v7 = vld [vmem:[#allocation7 + $0x1e8] ss:$16 sps:$4 sm:$0xff]  }
  0xcf   :  { %1915 = vmatprep.subr.bf16.mxu0 %v4352_v12 }
  0xd0   :  { %1028 = vmatpush1.bf16.msra.mxu1 %v4215_v46  ;;  %v4301_v46 = vld [vmem:[#allocation7 + $0x8c] ss:$16 sps:$4 sm:$0xff]  }
  0xd1   :  { %1029 = vmatprep.subr.bf16.mxu1 %v4220_v47  ;;  %v4299_v47 = vld [vmem:[#allocation7 + $0x88] ss:$16 sps:$4 sm:$0xff]  }
  0xd2   :  { %1916 = vmatpush1.bf16.msra.mxu0 %v4350_v14 }
  0xd3   :  { %1917 = vmatprep.subr.bf16.mxu0 %v4358_v16 }
  0xd4   :  { %1030 = vmatpush1.bf16.msra.mxu1 %v4218_v50  ;;  %v4311_v50 = vld [vmem:[#allocation7 + $0xc8] ss:$16 sps:$4 sm:$0xff]  }
  0xd5   :  { %1031 = vmatprep.subr.bf16.mxu1 %v4223_v52  ;;  %v4319_v52 = vld [vmem:[#allocation7 + $0xec] ss:$16 sps:$4 sm:$0xff]  }
  0xd6   :  { %1918 = vmatpush1.bf16.msra.mxu0 %v4356_v18 }
  0xd7   :  { %1919 = vmatprep.subr.bf16.mxu0 %v4364_v20 }
  0xd8   :  { %1032 = vmatpush1.bf16.msra.mxu1 %v4221_v55  ;;  %v4323_v55 = vld [vmem:[#allocation7 + $0x108] ss:$16 sps:$4 sm:$0xff]  }
  0xd9   :  { %1044 = vmatprep.subr.bf16.mxu1 %v4226_v56  ;;  %v4331_v56 = vld [vmem:[#allocation7 + $0x12c] ss:$16 sps:$4 sm:$0xff]  }
  0xda   :  { %1920 = vmatpush1.bf16.msra.mxu0 %v4362_v22 }
  0xdb   :  { %1034 = vmatmul.mubr.bf16.vlgmr.msra.gmra.mrb[4].mxu1 %v5041_v3  ;;  %v4236_v3 = vld [vmem:[#allocation5 + $0x288] ss:$16 sps:$4 sm:$0xff]   ;;  %1932 = vmatprep.subr.bf16.mxu0 %v4370_v24 }
  0xdc   :  { %1045 = vmatpush1.bf16.msra.mxu1 %v4224_v59  ;;  %1076 = vmatprep.mubr.bf16.mxu1 %v5038_v51  ;;  %v4239_v51 = vld [vmem:[#allocation5 + $0x2a8] ss:$16 sps:$4 sm:$0xff]  }
  0xdd   :  { %1046 = vmatprep.subr.bf16.mxu1 %v4229_v60  ;;  %v4335_v59 = vld [vmem:[#allocation7 + $0x148] ss:$16 sps:$4 sm:$0xff]   ;;  %v4343_v60 = vld [vmem:[#allocation7 + $0x16c] ss:$16 sps:$4 sm:$0xff]  }
  0xe0   :  { %1047 = vmatpush1.bf16.msra.mxu1 %v4227_v63  ;;  %v4347_v63 = vld [vmem:[#allocation7 + $0x188] ss:$16 sps:$4 sm:$0xff]  }
  0xe1   :  { %1048 = vmatprep.subr.bf16.mxu1 %v4232_v0  ;;  %v4355_v0 = vld [vmem:[#allocation7 + $0x1ac] ss:$16 sps:$4 sm:$0xff]  }
  0xe4   :  { %1049 = vmatpush1.bf16.msra.mxu1 %v4230_v4  ;;  %v4359_v4 = vld [vmem:[#allocation7 + $0x1c8] ss:$16 sps:$4 sm:$0xff]  }
  0xe5   :  { %1050 = vmatprep.subr.bf16.mxu1 %v4235_v6  ;;  %v4367_v6 = vld [vmem:[#allocation7 + $0x1ec] ss:$16 sps:$4 sm:$0xff]  }
  0xe8   :  { %1051 = vmatpush1.bf16.msra.mxu1 %v4233_v8  ;;  %v4373_v8 = vld [vmem:[#allocation7 + $0x20c] ss:$16 sps:$4 sm:$0xff]  }
  0xe9   :  { %1052 = vmatprep.subr.bf16.mxu1 %v4238_v9  ;;  %v235_v9 = vlaneseq }
  0xec   :  { %1053 = vmatpush1.bf16.msra.mxu1 %v4236_v3  ;;  %v5050_v3 = vshrl.u32 %v235_v9, 7  ;;  %v4427_v9 = vld [vmem:[#allocation7 + $0x32c] ss:$16 sps:$4 sm:$0xff]  }
  0xed   :  { %1054 = vmatprep.subr.bf16.mxu1 %v4241_v10 }
  0xee   :  { %v5053_v10 = vsub.s32 0, %v5050_v3 }
  0xf0   :  { %1055 = vmatpush1.bf16.msra.mxu1 %v4239_v51  ;;  %v5058_v51 = vld [vmem:[%s5120_s2] sm:$0xf] }
  0xf1   :  { %1056 = vmatprep.subr.bf16.mxu1 %v4244_v11  ;;  %v5061_v11 = vsub.s32 1, %v5050_v3  ;;  %v238_v12 = vrot.slane %v5058_v51, %v5053_v10 }
  0xf4   :  { %1057 = vmatpush1.bf16.msra.mxu1 %v4242_v13  ;;  %v242_v13 = vrot.slane %v5058_v51, %v5061_v11 }
  0xf5   :  { %1058 = vmatprep.subr.bf16.mxu1 %v4247_v15 }
  0xf8   :  { %1059 = vmatpush1.bf16.msra.mxu1 %v4245_v17 }
  0xf9   :  { %1060 = vmatprep.subr.bf16.mxu1 %v4250_v19 }
  0xfc   :  { %1061 = vmatpush1.bf16.msra.mxu1 %v4248_v21 }
  0xfd   :  { %1062 = vmatprep.subr.bf16.mxu1 %v4253_v23 }
 0x100   :  { %1063 = vmatpush1.bf16.msra.mxu1 %v4251_v25 }
 0x101   :  { %1064 = vmatprep.subr.bf16.mxu1 %v4256_v26 }
 0x104   :  { %1065 = vmatpush1.bf16.msra.mxu1 %v4254_v27 }
 0x105   :  { %1066 = vmatprep.subr.bf16.mxu1 %v4259_v28 }
 0x108   :  { %1067 = vmatpush1.bf16.msra.mxu1 %v4257_v29 }
 0x109   :  { %1068 = vmatprep.subr.bf16.mxu1 %v4262_v30 }
 0x10c   :  { %1069 = vmatpush1.bf16.msra.mxu1 %v4260_v31 }
 0x10d   :  { %1070 = vmatprep.subr.bf16.mxu1 %v4265_v32 }
 0x110   :  { %1071 = vmatpush1.bf16.msra.mxu1 %v4263_v33 }
 0x111   :  { %1072 = vmatprep.subr.bf16.mxu1 %v4268_v34 }
 0x114   :  { %1073 = vmatpush1.bf16.msra.mxu1 %v4266_v35 }
 0x115   :  { %1074 = vmatprep.subr.bf16.mxu1 %v4271_v36  ;;  %v4368_v36 = vld [vmem:[#allocation7 + $0x200] ss:$16 sps:$4 sm:$0xff]  }
 0x118   :  { %1075 = vmatpush1.bf16.msra.mxu1 %v4269_v37  ;;  %v4371_v37 = vld [vmem:[#allocation7 + $0x208] ss:$16 sps:$4 sm:$0xff]  }
 0x119   :  { %1975 = vmatprep.subr.bf16.mxu1 %v4277_v38  ;;  %v4376_v38 = vld [vmem:[#allocation7 + $0x224] ss:$16 sps:$4 sm:$0xff]  }
 0x11b   :  { %1077 = vmatmul.mubr.bf16.vlgmr.msra.gmra.mrb[4].mxu1 %v5043_v5  ;;  %v4313_v5 = vld [vmem:[#allocation7 + $0xcc] ss:$16 sps:$4 sm:$0xff]  }
 0x11c   :  { %1976 = vmatpush1.bf16.msra.mxu1 %v4275_v39  ;;  %v4379_v39 = vld [vmem:[#allocation7 + $0x22c] ss:$16 sps:$4 sm:$0xff]  }
 0x11d   :  { %1977 = vmatprep.subr.bf16.mxu1 %v4283_v40  ;;  %v4374_v40 = vld [vmem:[#allocation7 + $0x220] ss:$16 sps:$4 sm:$0xff]  }
 0x120   :  { %1978 = vmatpush1.bf16.msra.mxu1 %v4281_v41  ;;  %v4377_v41 = vld [vmem:[#allocation7 + $0x228] ss:$16 sps:$4 sm:$0xff]  }
 0x121   :  { %1979 = vmatprep.subr.bf16.mxu1 %v4289_v42  ;;  %v4382_v42 = vld [vmem:[#allocation7 + $0x244] ss:$16 sps:$4 sm:$0xff]  }
 0x124   :  { %1980 = vmatpush1.bf16.msra.mxu1 %v4287_v43  ;;  %v4385_v43 = vld [vmem:[#allocation7 + $0x24c] ss:$16 sps:$4 sm:$0xff]  }
 0x125   :  { %1981 = vmatprep.subr.bf16.mxu1 %v4295_v44  ;;  %v4380_v44 = vld [vmem:[#allocation7 + $0x240] ss:$16 sps:$4 sm:$0xff]  }
 0x128   :  { %1982 = vmatpush1.bf16.msra.mxu1 %v4293_v45  ;;  %v4383_v45 = vld [vmem:[#allocation7 + $0x248] ss:$16 sps:$4 sm:$0xff]  }
 0x129   :  { %1983 = vmatprep.subr.bf16.mxu1 %v4301_v46  ;;  %v4388_v46 = vld [vmem:[#allocation7 + $0x264] ss:$16 sps:$4 sm:$0xff]  }
 0x12c   :  { %1984 = vmatpush1.bf16.msra.mxu1 %v4299_v47  ;;  %v4391_v47 = vld [vmem:[#allocation7 + $0x26c] ss:$16 sps:$4 sm:$0xff]  }
 0x12d   :  { %1985 = vmatprep.subr.bf16.mxu1 %v4307_v48  ;;  %v4386_v48 = vld [vmem:[#allocation7 + $0x260] ss:$16 sps:$4 sm:$0xff]  }
 0x130   :  { %1986 = vmatpush1.bf16.msra.mxu1 %v4305_v49  ;;  %v4389_v49 = vld [vmem:[#allocation7 + $0x268] ss:$16 sps:$4 sm:$0xff]  }
 0x131   :  { %1987 = vmatprep.subr.bf16.mxu1 %v4313_v5  ;;  %v4394_v5 = vld [vmem:[#allocation7 + $0x284] ss:$16 sps:$4 sm:$0xff]  }
 0x134   :  { %1988 = vmatpush1.bf16.msra.mxu1 %v4311_v50  ;;  %v4397_v50 = vld [vmem:[#allocation7 + $0x28c] ss:$16 sps:$4 sm:$0xff]  }
 0x135   :  { %1989 = vmatprep.subr.bf16.mxu1 %v4319_v52  ;;  %v4392_v52 = vld [vmem:[#allocation7 + $0x280] ss:$16 sps:$4 sm:$0xff]  }
 0x138   :  { %1990 = vmatpush1.bf16.msra.mxu1 %v4317_v53  ;;  %v4395_v53 = vld [vmem:[#allocation7 + $0x288] ss:$16 sps:$4 sm:$0xff]  }
 0x139   :  { %1991 = vmatprep.subr.bf16.mxu1 %v4325_v54  ;;  %v4400_v54 = vld [vmem:[#allocation7 + $0x2a4] ss:$16 sps:$4 sm:$0xff]  }
 0x13c   :  { %1992 = vmatpush1.bf16.msra.mxu1 %v4323_v55  ;;  %v4403_v55 = vld [vmem:[#allocation7 + $0x2ac] ss:$16 sps:$4 sm:$0xff]  }
 0x13d   :  { %1993 = vmatprep.subr.bf16.mxu1 %v4331_v56  ;;  %v4398_v56 = vld [vmem:[#allocation7 + $0x2a0] ss:$16 sps:$4 sm:$0xff]  }
 0x140   :  { %1994 = vmatpush1.bf16.msra.mxu1 %v4329_v57  ;;  %v4401_v57 = vld [vmem:[#allocation7 + $0x2a8] ss:$16 sps:$4 sm:$0xff]  }
 0x141   :  { %1995 = vmatprep.subr.bf16.mxu1 %v4337_v58  ;;  %v4406_v58 = vld [vmem:[#allocation7 + $0x2c4] ss:$16 sps:$4 sm:$0xff]  }
 0x144   :  { %1996 = vmatpush1.bf16.msra.mxu1 %v4335_v59  ;;  %v4409_v59 = vld [vmem:[#allocation7 + $0x2cc] ss:$16 sps:$4 sm:$0xff]  }
 0x145   :  { %1997 = vmatprep.subr.bf16.mxu1 %v4343_v60  ;;  %v4404_v60 = vld [vmem:[#allocation7 + $0x2c0] ss:$16 sps:$4 sm:$0xff]  }
 0x148   :  { %1998 = vmatpush1.bf16.msra.mxu1 %v4341_v61  ;;  %v4407_v61 = vld [vmem:[#allocation7 + $0x2c8] ss:$16 sps:$4 sm:$0xff]  }
 0x149   :  { %1999 = vmatprep.subr.bf16.mxu1 %v4349_v62  ;;  %v4412_v62 = vld [vmem:[#allocation7 + $0x2e4] ss:$16 sps:$4 sm:$0xff]  }
 0x14c   :  { %2000 = vmatpush1.bf16.msra.mxu1 %v4347_v63  ;;  %v4415_v63 = vld [vmem:[#allocation7 + $0x2ec] ss:$16 sps:$4 sm:$0xff]  }
 0x14d   :  { %2001 = vmatprep.subr.bf16.mxu1 %v4355_v0  ;;  %v4410_v0 = vld [vmem:[#allocation7 + $0x2e0] ss:$16 sps:$4 sm:$0xff]  }
 0x150   :  { %2002 = vmatpush1.bf16.msra.mxu1 %v4353_v1  ;;  %v4413_v1 = vld [vmem:[#allocation7 + $0x2e8] ss:$16 sps:$4 sm:$0xff]  }
 0x151   :  { %2003 = vmatprep.subr.bf16.mxu1 %v4361_v2  ;;  %v4418_v2 = vld [vmem:[#allocation7 + $0x304] ss:$16 sps:$4 sm:$0xff]  }
 0x154   :  { %2004 = vmatpush1.bf16.msra.mxu1 %v4359_v4  ;;  %v4421_v4 = vld [vmem:[#allocation7 + $0x30c] ss:$16 sps:$4 sm:$0xff]  }
 0x155   :  { %2005 = vmatprep.subr.bf16.mxu1 %v4367_v6  ;;  %v4416_v6 = vld [vmem:[#allocation7 + $0x300] ss:$16 sps:$4 sm:$0xff]  }
 0x158   :  { %2006 = vmatpush1.bf16.msra.mxu1 %v4365_v7  ;;  %v4419_v7 = vld [vmem:[#allocation7 + $0x308] ss:$16 sps:$4 sm:$0xff]  }
 0x159   :  { %2018 = vmatprep.subr.bf16.mxu1 %v4373_v8  ;;  %v4424_v8 = vld [vmem:[#allocation7 + $0x324] ss:$16 sps:$4 sm:$0xff]  }
 0x16e   :  { %v949_v14 = vpop.f32.mrb[0].mxu1 }
 0x16f   :  { %v950_v15 = vadd.f32 %v949_v14, %v238_v12  ;;  %v951_v16 = vpop.f32.mrb[1].mxu1  ;;  %v4430_v14 = vld [vmem:[#allocation7 + $0x344] ss:$16 sps:$4 sm:$0xff]  }
 0x170   :  { %v952_v17 = vadd.f32 %v951_v16, %v242_v13  ;;  %v953_v18 = vpop.f32.mrb[2].mxu1  ;;  %v992_v19 = vpop.f32.mrb[0].mxu0  ;;  %v4428_v16 = vld [vmem:[#allocation7 + $0x340] ss:$16 sps:$4 sm:$0xff]  }
 0x171   :  { %v954_v20 = vadd.f32 %v953_v18, %v238_v12  ;;  %v993_v21 = vadd.f32 %v992_v19, %v950_v15  ;;  %v955_v22 = vpop.f32.mrb[3].mxu1  ;;  %v994_v23 = vpop.f32.mrb[1].mxu0  ;;  %v4422_v12 = vld [vmem:[#allocation7 + $0x320] ss:$16 sps:$4 sm:$0xff]   ;;  %v4433_v15 = vld [vmem:[#allocation7 + $0x34c] ss:$16 sps:$4 sm:$0xff]  }
 0x172   :  { %v956_v24 = vadd.f32 %v955_v22, %v242_v13  ;;  %v995_v25 = vadd.f32 %v994_v23, %v952_v17  ;;  %v996_v26 = vpop.f32.mrb[2].mxu0  ;;  %v4425_v13 = vld [vmem:[#allocation7 + $0x328] ss:$16 sps:$4 sm:$0xff]   ;;  %v4436_v18 = vld [vmem:[#allocation7 + $0x364] ss:$16 sps:$4 sm:$0xff]  }
 0x173   :  { %v1087_v27 = vmax.f32 %v993_v21, 0.0  ;;  %v997_v28 = vadd.f32 %v996_v26, %v954_v20  ;;  %v998_v29 = vpop.f32.mrb[3].mxu0  ;;  %v4431_v17 = vld [vmem:[#allocation7 + $0x348] ss:$16 sps:$4 sm:$0xff]   ;;  %v4439_v19 = vld [vmem:[#allocation7 + $0x36c] ss:$16 sps:$4 sm:$0xff]  }
 0x174   :  { %v999_v30 = vadd.f32 %v998_v29, %v956_v24  ;;  %v1088_v32 = vmax.f32 %v995_v25, 0.0  ;;  %v4434_v20 = vld [vmem:[#allocation7 + $0x360] ss:$16 sps:$4 sm:$0xff]   ;;  %v4437_v21 = vld [vmem:[#allocation7 + $0x368] ss:$16 sps:$4 sm:$0xff]  }
 0x175   :  { %v1091_v31 = vmax.f32 %v997_v28, 0.0  ;;  %v4442_v22 = vld [vmem:[#allocation7 + $0x384] ss:$16 sps:$4 sm:$0xff]   ;;  %v4445_v23 = vld [vmem:[#allocation7 + $0x38c] ss:$16 sps:$4 sm:$0xff]  }
 0x176   :  { %v1092_v33 = vmax.f32 %v999_v30, 0.0  ;;  %v4440_v24 = vld [vmem:[#allocation7 + $0x380] ss:$16 sps:$4 sm:$0xff]   ;;  %v4443_v25 = vld [vmem:[#allocation7 + $0x388] ss:$16 sps:$4 sm:$0xff]  }
 0x177   :  { %v1095_v34 = vpack.c.bf16 %v1091_v31, %v1087_v27  ;;  %v4448_v26 = vld [vmem:[#allocation7 + $0x3a4] ss:$16 sps:$4 sm:$0xff]   ;;  %v4451_v27 = vld [vmem:[#allocation7 + $0x3ac] ss:$16 sps:$4 sm:$0xff]   ;;  %v4446_v28 = vld [vmem:[#allocation7 + $0x3a0] ss:$16 sps:$4 sm:$0xff]  }
 0x178   :  { %v1096_v35 = vpack.c.bf16 %v1092_v33, %v1088_v32  ;;  %v4449_v29 = vld [vmem:[#allocation7 + $0x3a8] ss:$16 sps:$4 sm:$0xff]   ;;  %v4454_v30 = vld [vmem:[#allocation7 + $0x3c4] ss:$16 sps:$4 sm:$0xff]   ;;  %v4457_v31 = vld [vmem:[#allocation7 + $0x3cc] ss:$16 sps:$4 sm:$0xff]  }
 0x179   :  { %v4452_v32 = vld [vmem:[#allocation7 + $0x3c0] ss:$16 sps:$4 sm:$0xff]   ;;  %v4455_v33 = vld [vmem:[#allocation7 + $0x3c8] ss:$16 sps:$4 sm:$0xff]  }
 0x17a   :  { %1921 = vmatprep.mubr.bf16.mxu0 %v1096_v35  ;;  %2007 = vmatprep.mubr.bf16.mxu1 %v1096_v35  ;;  %v4463_v35 = vld [vmem:[#allocation7 + $0x3ec] ss:$16 sps:$4 sm:$0xff]  }
 0x17b   :  { %1922 = vmatmul.mubr.bf16.vlgmr.msra.gmra.mrb[4].mxu0 %v1095_v34  ;;  %2008 = vmatmul.mubr.bf16.vlgmr.msra.gmra.mrb[8].mxu1 %v1095_v34  ;;  %v4460_v34 = vld [vmem:[#allocation7 + $0x3e4] ss:$16 sps:$4 sm:$0xff]  }
 0x17c   :  { %1933 = vmatpush1.bf16.msra.mxu0 %v4368_v36  ;;  %2019 = vmatpush1.bf16.msra.mxu1 %v4371_v37  ;;  %v4458_v36 = vld [vmem:[#allocation7 + $0x3e0] ss:$16 sps:$4 sm:$0xff]   ;;  %v4461_v37 = vld [vmem:[#allocation7 + $0x3e8] ss:$16 sps:$4 sm:$0xff]  }
 0x17d   :  { %1934 = vmatprep.subr.bf16.mxu0 %v4376_v38  ;;  %2020 = vmatprep.subr.bf16.mxu1 %v4379_v39  ;;  %v4466_v38 = vld [vmem:[#allocation8 + $0x4] ss:$16 sps:$4 sm:$0xff]   ;;  %v4469_v39 = vld [vmem:[#allocation8 + $0xc] ss:$16 sps:$4 sm:$0xff]  }
 0x180   :  { %1935 = vmatpush1.bf16.msra.mxu0 %v4374_v40  ;;  %2021 = vmatpush1.bf16.msra.mxu1 %v4377_v41  ;;  %v5068_v40 = vsub.s32 2, %v5050_v3  ;;  %v5071_v41 = vsub.s32 3, %v5050_v3 }
 0x181   :  { %1936 = vmatprep.subr.bf16.mxu0 %v4382_v42  ;;  %2022 = vmatprep.subr.bf16.mxu1 %v4385_v43 }
 0x182   :  { %v246_v42 = vrot.slane %v5058_v51, %v5068_v40  ;;  %v250_v43 = vrot.slane %v5058_v51, %v5071_v41  ;;  %v4470_v51 = vld [vmem:[#allocation8 + $0x20] ss:$16 sps:$4 sm:$0xff]  }
 0x184   :  { %1937 = vmatpush1.bf16.msra.mxu0 %v4380_v44  ;;  %2023 = vmatpush1.bf16.msra.mxu1 %v4383_v45 }
 0x185   :  { %1938 = vmatprep.subr.bf16.mxu0 %v4388_v46  ;;  %2024 = vmatprep.subr.bf16.mxu1 %v4391_v47 }
 0x188   :  { %1939 = vmatpush1.bf16.msra.mxu0 %v4386_v48  ;;  %2025 = vmatpush1.bf16.msra.mxu1 %v4389_v49 }
 0x189   :  { %1940 = vmatprep.subr.bf16.mxu0 %v4394_v5  ;;  %2026 = vmatprep.subr.bf16.mxu1 %v4397_v50 }
 0x18c   :  { %1941 = vmatpush1.bf16.msra.mxu0 %v4392_v52  ;;  %2027 = vmatpush1.bf16.msra.mxu1 %v4395_v53 }
 0x18d   :  { %1942 = vmatprep.subr.bf16.mxu0 %v4400_v54  ;;  %2028 = vmatprep.subr.bf16.mxu1 %v4403_v55 }
 0x190   :  { %1943 = vmatpush1.bf16.msra.mxu0 %v4398_v56  ;;  %2029 = vmatpush1.bf16.msra.mxu1 %v4401_v57  ;;  %v4464_v57 = vld [vmem:[#allocation8] ss:$16 sps:$4 sm:$0xff]  }
 0x191   :  { %1944 = vmatprep.subr.bf16.mxu0 %v4406_v58  ;;  %2030 = vmatprep.subr.bf16.mxu1 %v4409_v59  ;;  %v4467_v58 = vld [vmem:[#allocation8 + $0x8] ss:$16 sps:$4 sm:$0xff]   ;;  %v4472_v59 = vld [vmem:[#allocation8 + $0x24] ss:$16 sps:$4 sm:$0xff]  }
 0x194   :  { %1945 = vmatpush1.bf16.msra.mxu0 %v4404_v60  ;;  %2031 = vmatpush1.bf16.msra.mxu1 %v4407_v61  ;;  %v4475_v60 = vld [vmem:[#allocation8 + $0x2c] ss:$16 sps:$4 sm:$0xff]   ;;  %v4473_v61 = vld [vmem:[#allocation8 + $0x28] ss:$16 sps:$4 sm:$0xff]  }
 0x195   :  { %1946 = vmatprep.subr.bf16.mxu0 %v4412_v62  ;;  %2032 = vmatprep.subr.bf16.mxu1 %v4415_v63  ;;  %v4478_v62 = vld [vmem:[#allocation8 + $0x44] ss:$16 sps:$4 sm:$0xff]   ;;  %v4481_v63 = vld [vmem:[#allocation8 + $0x4c] ss:$16 sps:$4 sm:$0xff]  }
 0x198   :  { %1947 = vmatpush1.bf16.msra.mxu0 %v4410_v0  ;;  %2033 = vmatpush1.bf16.msra.mxu1 %v4413_v1  ;;  %v4476_v0 = vld [vmem:[#allocation8 + $0x40] ss:$16 sps:$4 sm:$0xff]   ;;  %v4479_v1 = vld [vmem:[#allocation8 + $0x48] ss:$16 sps:$4 sm:$0xff]  }
 0x199   :  { %1948 = vmatprep.subr.bf16.mxu0 %v4418_v2  ;;  %2034 = vmatprep.subr.bf16.mxu1 %v4421_v4  ;;  %v4484_v2 = vld [vmem:[#allocation8 + $0x64] ss:$16 sps:$4 sm:$0xff]   ;;  %v4487_v4 = vld [vmem:[#allocation8 + $0x6c] ss:$16 sps:$4 sm:$0xff]  }
 0x19c   :  { %1949 = vmatpush1.bf16.msra.mxu0 %v4416_v6  ;;  %2035 = vmatpush1.bf16.msra.mxu1 %v4419_v7  ;;  %v4482_v6 = vld [vmem:[#allocation8 + $0x60] ss:$16 sps:$4 sm:$0xff]   ;;  %v4485_v7 = vld [vmem:[#allocation8 + $0x68] ss:$16 sps:$4 sm:$0xff]  }
 0x19d   :  { %1950 = vmatprep.subr.bf16.mxu0 %v4424_v8  ;;  %2036 = vmatprep.subr.bf16.mxu1 %v4427_v9  ;;  %v4490_v8 = vld [vmem:[#allocation8 + $0x84] ss:$16 sps:$4 sm:$0xff]   ;;  %v4493_v9 = vld [vmem:[#allocation8 + $0x8c] ss:$16 sps:$4 sm:$0xff]  }
 0x1a0   :  { %1951 = vmatpush1.bf16.msra.mxu0 %v4422_v12  ;;  %2037 = vmatpush1.bf16.msra.mxu1 %v4425_v13  ;;  %v4488_v12 = vld [vmem:[#allocation8 + $0x80] ss:$16 sps:$4 sm:$0xff]   ;;  %v4491_v13 = vld [vmem:[#allocation8 + $0x88] ss:$16 sps:$4 sm:$0xff]  }
 0x1a1   :  { %1952 = vmatprep.subr.bf16.mxu0 %v4430_v14  ;;  %2038 = vmatprep.subr.bf16.mxu1 %v4433_v15  ;;  %v4496_v14 = vld [vmem:[#allocation8 + $0xa4] ss:$16 sps:$4 sm:$0xff]   ;;  %v4499_v15 = vld [vmem:[#allocation8 + $0xac] ss:$16 sps:$4 sm:$0xff]  }
 0x1a4   :  { %1953 = vmatpush1.bf16.msra.mxu0 %v4428_v16  ;;  %2039 = vmatpush1.bf16.msra.mxu1 %v4431_v17  ;;  %v4494_v16 = vld [vmem:[#allocation8 + $0xa0] ss:$16 sps:$4 sm:$0xff]   ;;  %v4497_v17 = vld [vmem:[#allocation8 + $0xa8] ss:$16 sps:$4 sm:$0xff]  }
 0x1a5   :  { %1954 = vmatprep.subr.bf16.mxu0 %v4436_v18  ;;  %2040 = vmatprep.subr.bf16.mxu1 %v4439_v19  ;;  %v4502_v18 = vld [vmem:[#allocation8 + $0xc4] ss:$16 sps:$4 sm:$0xff]   ;;  %v4505_v19 = vld [vmem:[#allocation8 + $0xcc] ss:$16 sps:$4 sm:$0xff]  }
 0x1a8   :  { %1955 = vmatpush1.bf16.msra.mxu0 %v4434_v20  ;;  %2041 = vmatpush1.bf16.msra.mxu1 %v4437_v21  ;;  %v4500_v20 = vld [vmem:[#allocation8 + $0xc0] ss:$16 sps:$4 sm:$0xff]   ;;  %v4503_v21 = vld [vmem:[#allocation8 + $0xc8] ss:$16 sps:$4 sm:$0xff]  }
 0x1a9   :  { %1956 = vmatprep.subr.bf16.mxu0 %v4442_v22  ;;  %2042 = vmatprep.subr.bf16.mxu1 %v4445_v23  ;;  %v4508_v22 = vld [vmem:[#allocation8 + $0xe4] ss:$16 sps:$4 sm:$0xff]   ;;  %v4511_v23 = vld [vmem:[#allocation8 + $0xec] ss:$16 sps:$4 sm:$0xff]  }
 0x1ac   :  { %1957 = vmatpush1.bf16.msra.mxu0 %v4440_v24  ;;  %2043 = vmatpush1.bf16.msra.mxu1 %v4443_v25  ;;  %v4506_v24 = vld [vmem:[#allocation8 + $0xe0] ss:$16 sps:$4 sm:$0xff]   ;;  %v4509_v25 = vld [vmem:[#allocation8 + $0xe8] ss:$16 sps:$4 sm:$0xff]  }
 0x1ad   :  { %1958 = vmatprep.subr.bf16.mxu0 %v4448_v26  ;;  %2044 = vmatprep.subr.bf16.mxu1 %v4451_v27  ;;  %v4514_v26 = vld [vmem:[#allocation8 + $0x104] ss:$16 sps:$4 sm:$0xff]   ;;  %v4517_v27 = vld [vmem:[#allocation8 + $0x10c] ss:$16 sps:$4 sm:$0xff]  }
 0x1b0   :  { %1959 = vmatpush1.bf16.msra.mxu0 %v4446_v28  ;;  %2045 = vmatpush1.bf16.msra.mxu1 %v4449_v29  ;;  %v4512_v28 = vld [vmem:[#allocation8 + $0x100] ss:$16 sps:$4 sm:$0xff]   ;;  %v4515_v29 = vld [vmem:[#allocation8 + $0x108] ss:$16 sps:$4 sm:$0xff]  }
 0x1b1   :  { %1960 = vmatprep.subr.bf16.mxu0 %v4454_v30  ;;  %2046 = vmatprep.subr.bf16.mxu1 %v4457_v31  ;;  %v4520_v30 = vld [vmem:[#allocation8 + $0x124] ss:$16 sps:$4 sm:$0xff]   ;;  %v4523_v31 = vld [vmem:[#allocation8 + $0x12c] ss:$16 sps:$4 sm:$0xff]  }
 0x1b4   :  { %1961 = vmatpush1.bf16.msra.mxu0 %v4452_v32  ;;  %2047 = vmatpush1.bf16.msra.mxu1 %v4455_v33  ;;  %v4518_v32 = vld [vmem:[#allocation8 + $0x120] ss:$16 sps:$4 sm:$0xff]   ;;  %v4521_v33 = vld [vmem:[#allocation8 + $0x128] ss:$16 sps:$4 sm:$0xff]  }
 0x1b5   :  { %1962 = vmatprep.subr.bf16.mxu0 %v4460_v34  ;;  %2048 = vmatprep.subr.bf16.mxu1 %v4463_v35  ;;  %v4526_v34 = vld [vmem:[#allocation8 + $0x144] ss:$16 sps:$4 sm:$0xff]   ;;  %v4529_v35 = vld [vmem:[#allocation8 + $0x14c] ss:$16 sps:$4 sm:$0xff]  }
 0x1b8   :  { %1963 = vmatpush1.bf16.msra.mxu0 %v4458_v36  ;;  %2049 = vmatpush1.bf16.msra.mxu1 %v4461_v37  ;;  %v4524_v36 = vld [vmem:[#allocation8 + $0x140] ss:$16 sps:$4 sm:$0xff]   ;;  %v4527_v37 = vld [vmem:[#allocation8 + $0x148] ss:$16 sps:$4 sm:$0xff]  }
 0x1b9   :  { %2863 = vmatprep.subr.bf16.mxu0 %v4466_v38  ;;  %2949 = vmatprep.subr.bf16.mxu1 %v4469_v39  ;;  %v4532_v38 = vld [vmem:[#allocation8 + $0x164] ss:$16 sps:$4 sm:$0xff]   ;;  %v4535_v39 = vld [vmem:[#allocation8 + $0x16c] ss:$16 sps:$4 sm:$0xff]  }
 0x1ee   :  { %v1078_v44 = vpop.f32.mrb[4].mxu1 }
 0x1ef   :  { %v4016_v45 = vadd.f32 %v1078_v44, %v246_v42  ;;  %v1080_v46 = vpop.f32.mrb[5].mxu1  ;;  %v4538_v44 = vld [vmem:[#allocation8 + $0x184] ss:$16 sps:$4 sm:$0xff]  }
 0x1f0   :  { %v4017_v47 = vadd.f32 %v1080_v46, %v250_v43  ;;  %v1082_v48 = vpop.f32.mrb[6].mxu1  ;;  %v4536_v46 = vld [vmem:[#allocation8 + $0x180] ss:$16 sps:$4 sm:$0xff]  }
 0x1f1   :  { %v4018_v49 = vadd.f32 %v1082_v48, %v246_v42  ;;  %v1084_v5 = vpop.f32.mrb[7].mxu1  ;;  %v1089_v52 = vmax.f32 %v4016_v45, 0.0  ;;  %v4530_v42 = vld [vmem:[#allocation8 + $0x160] ss:$16 sps:$4 sm:$0xff]   ;;  %v4541_v45 = vld [vmem:[#allocation8 + $0x18c] ss:$16 sps:$4 sm:$0xff]  }
 0x1f2   :  { %v4019_v50 = vadd.f32 %v1084_v5, %v250_v43  ;;  %v1090_v54 = vmax.f32 %v4017_v47, 0.0  ;;  %v4533_v43 = vld [vmem:[#allocation8 + $0x168] ss:$16 sps:$4 sm:$0xff]   ;;  %v4544_v48 = vld [vmem:[#allocation8 + $0x1a4] ss:$16 sps:$4 sm:$0xff]  }
 0x1f3   :  { %v1093_v53 = vmax.f32 %v4018_v49, 0.0  ;;  %v4539_v47 = vld [vmem:[#allocation8 + $0x188] ss:$16 sps:$4 sm:$0xff]   ;;  %v4547_v49 = vld [vmem:[#allocation8 + $0x1ac] ss:$16 sps:$4 sm:$0xff]  }
 0x1f4   :  { %v1094_v55 = vmax.f32 %v4019_v50, 0.0  ;;  %v4542_v5 = vld [vmem:[#allocation8 + $0x1a0] ss:$16 sps:$4 sm:$0xff]   ;;  %v4545_v50 = vld [vmem:[#allocation8 + $0x1a8] ss:$16 sps:$4 sm:$0xff]  }
 0x1f5   :  { %v1097_v3 = vpack.c.bf16 %v1093_v53, %v1089_v52  ;;  %v4550_v52 = vld [vmem:[#allocation8 + $0x1c4] ss:$16 sps:$4 sm:$0xff]   ;;  %v4553_v53 = vld [vmem:[#allocation8 + $0x1cc] ss:$16 sps:$4 sm:$0xff]  }
 0x1f6   :  { %v1098_v56 = vpack.c.bf16 %v1094_v55, %v1090_v54  ;;  %v4548_v54 = vld [vmem:[#allocation8 + $0x1c0] ss:$16 sps:$4 sm:$0xff]   ;;  %v4551_v55 = vld [vmem:[#allocation8 + $0x1c8] ss:$16 sps:$4 sm:$0xff]  }
 0x1f8   :  { %1964 = vmatprep.mubr.bf16.mxu0 %v1098_v56  ;;  %2050 = vmatprep.mubr.bf16.mxu1 %v1098_v56  ;;  %v4559_v56 = vld [vmem:[#allocation8 + $0x1ec] ss:$16 sps:$4 sm:$0xff]  }
 0x1f9   :  { %1965 = vmatmul.mubr.bf16.vlgmr.msra.gmra.mrb[4].mxu0 %v1097_v3  ;;  %2051 = vmatmul.mubr.bf16.vlgmr.msra.gmra.mrb[8].mxu1 %v1097_v3  ;;  %v4556_v3 = vld [vmem:[#allocation8 + $0x1e4] ss:$16 sps:$4 sm:$0xff]  }
 0x1fa   :  { %2864 = vmatpush1.bf16.msra.mxu0 %v4464_v57  ;;  %2950 = vmatpush1.bf16.msra.mxu1 %v4467_v58  ;;  %v4554_v57 = vld [vmem:[#allocation8 + $0x1e0] ss:$16 sps:$4 sm:$0xff]   ;;  %v4557_v58 = vld [vmem:[#allocation8 + $0x1e8] ss:$16 sps:$4 sm:$0xff]  }
 0x1fb   :  { %2865 = vmatprep.subr.bf16.mxu0 %v4472_v59  ;;  %2951 = vmatprep.subr.bf16.mxu1 %v4475_v60  ;;  %v4562_v59 = vld [vmem:[#allocation8 + $0x204] ss:$16 sps:$4 sm:$0xff]   ;;  %v4565_v60 = vld [vmem:[#allocation8 + $0x20c] ss:$16 sps:$4 sm:$0xff]  }
 0x1fe   :  { %2866 = vmatpush1.bf16.msra.mxu0 %v4470_v51  ;;  %2952 = vmatpush1.bf16.msra.mxu1 %v4473_v61  ;;  %v1227_v51 = vld [vmem:[%s5122_s4] sm:$0xf] }
 0x1ff   :  { %2867 = vmatprep.subr.bf16.mxu0 %v4478_v62  ;;  %2953 = vmatprep.subr.bf16.mxu1 %v4481_v63  ;;  %v1232_v61 = vrot.slane %v1227_v51, %v5053_v10  ;;  %v1240_v62 = vrot.slane %v1227_v51, %v5068_v40  ;;  %v1236_v63 = vrot.slane %v1227_v51, %v5061_v11 }
 0x202   :  { %2868 = vmatpush1.bf16.msra.mxu0 %v4476_v0  ;;  %2954 = vmatpush1.bf16.msra.mxu1 %v4479_v1  ;;  %v1244_v0 = vrot.slane %v1227_v51, %v5071_v41  ;;  %v4607_v51 = vld [vmem:[#allocation8 + $0x2ec] ss:$16 sps:$4 sm:$0xff]  }
 0x203   :  { %2869 = vmatprep.subr.bf16.mxu0 %v4484_v2  ;;  %2955 = vmatprep.subr.bf16.mxu1 %v4487_v4 }
 0x206   :  { %2870 = vmatpush1.bf16.msra.mxu0 %v4482_v6  ;;  %2956 = vmatpush1.bf16.msra.mxu1 %v4485_v7 }
 0x207   :  { %2871 = vmatprep.subr.bf16.mxu0 %v4490_v8  ;;  %2957 = vmatprep.subr.bf16.mxu1 %v4493_v9 }
 0x20a   :  { %2872 = vmatpush1.bf16.msra.mxu0 %v4488_v12  ;;  %2958 = vmatpush1.bf16.msra.mxu1 %v4491_v13 }
 0x20b   :  { %2873 = vmatprep.subr.bf16.mxu0 %v4496_v14  ;;  %2959 = vmatprep.subr.bf16.mxu1 %v4499_v15 }
 0x20e   :  { %2874 = vmatpush1.bf16.msra.mxu0 %v4494_v16  ;;  %2960 = vmatpush1.bf16.msra.mxu1 %v4497_v17 }
 0x20f   :  { %2875 = vmatprep.subr.bf16.mxu0 %v4502_v18  ;;  %2961 = vmatprep.subr.bf16.mxu1 %v4505_v19 }
 0x212   :  { %2876 = vmatpush1.bf16.msra.mxu0 %v4500_v20  ;;  %2962 = vmatpush1.bf16.msra.mxu1 %v4503_v21 }
 0x213   :  { %2877 = vmatprep.subr.bf16.mxu0 %v4508_v22  ;;  %2963 = vmatprep.subr.bf16.mxu1 %v4511_v23 }
 0x216   :  { %2878 = vmatpush1.bf16.msra.mxu0 %v4506_v24  ;;  %2964 = vmatpush1.bf16.msra.mxu1 %v4509_v25 }
 0x217   :  { %2879 = vmatprep.subr.bf16.mxu0 %v4514_v26  ;;  %2965 = vmatprep.subr.bf16.mxu1 %v4517_v27 }
 0x21a   :  { %2880 = vmatpush1.bf16.msra.mxu0 %v4512_v28  ;;  %2966 = vmatpush1.bf16.msra.mxu1 %v4515_v29 }
 0x21b   :  { %2881 = vmatprep.subr.bf16.mxu0 %v4520_v30  ;;  %2967 = vmatprep.subr.bf16.mxu1 %v4523_v31 }
 0x21e   :  { %2882 = vmatpush1.bf16.msra.mxu0 %v4518_v32  ;;  %2968 = vmatpush1.bf16.msra.mxu1 %v4521_v33  ;;  %v4560_v33 = vld [vmem:[#allocation8 + $0x200] ss:$16 sps:$4 sm:$0xff]  }
 0x21f   :  { %2883 = vmatprep.subr.bf16.mxu0 %v4526_v34  ;;  %2969 = vmatprep.subr.bf16.mxu1 %v4529_v35  ;;  %v4563_v34 = vld [vmem:[#allocation8 + $0x208] ss:$16 sps:$4 sm:$0xff]   ;;  %v4568_v35 = vld [vmem:[#allocation8 + $0x224] ss:$16 sps:$4 sm:$0xff]  }
 0x222   :  { %2884 = vmatpush1.bf16.msra.mxu0 %v4524_v36  ;;  %2970 = vmatpush1.bf16.msra.mxu1 %v4527_v37  ;;  %v4571_v36 = vld [vmem:[#allocation8 + $0x22c] ss:$16 sps:$4 sm:$0xff]   ;;  %v4566_v37 = vld [vmem:[#allocation8 + $0x220] ss:$16 sps:$4 sm:$0xff]  }
 0x223   :  { %2885 = vmatprep.subr.bf16.mxu0 %v4532_v38  ;;  %2971 = vmatprep.subr.bf16.mxu1 %v4535_v39  ;;  %v4569_v38 = vld [vmem:[#allocation8 + $0x228] ss:$16 sps:$4 sm:$0xff]   ;;  %v4574_v39 = vld [vmem:[#allocation8 + $0x244] ss:$16 sps:$4 sm:$0xff]  }
 0x226   :  { %2886 = vmatpush1.bf16.msra.mxu0 %v4530_v42  ;;  %2972 = vmatpush1.bf16.msra.mxu1 %v4533_v43  ;;  %v4577_v42 = vld [vmem:[#allocation8 + $0x24c] ss:$16 sps:$4 sm:$0xff]   ;;  %v4572_v43 = vld [vmem:[#allocation8 + $0x240] ss:$16 sps:$4 sm:$0xff]  }
 0x227   :  { %2887 = vmatprep.subr.bf16.mxu0 %v4538_v44  ;;  %2973 = vmatprep.subr.bf16.mxu1 %v4541_v45  ;;  %v4575_v44 = vld [vmem:[#allocation8 + $0x248] ss:$16 sps:$4 sm:$0xff]   ;;  %v4580_v45 = vld [vmem:[#allocation8 + $0x264] ss:$16 sps:$4 sm:$0xff]  }
 0x22a   :  { %2888 = vmatpush1.bf16.msra.mxu0 %v4536_v46  ;;  %2974 = vmatpush1.bf16.msra.mxu1 %v4539_v47  ;;  %v4583_v46 = vld [vmem:[#allocation8 + $0x26c] ss:$16 sps:$4 sm:$0xff]   ;;  %v4578_v47 = vld [vmem:[#allocation8 + $0x260] ss:$16 sps:$4 sm:$0xff]  }
 0x22b   :  { %2889 = vmatprep.subr.bf16.mxu0 %v4544_v48  ;;  %2975 = vmatprep.subr.bf16.mxu1 %v4547_v49  ;;  %v4581_v48 = vld [vmem:[#allocation8 + $0x268] ss:$16 sps:$4 sm:$0xff]   ;;  %v4586_v49 = vld [vmem:[#allocation8 + $0x284] ss:$16 sps:$4 sm:$0xff]  }
 0x22e   :  { %2890 = vmatpush1.bf16.msra.mxu0 %v4542_v5  ;;  %2976 = vmatpush1.bf16.msra.mxu1 %v4545_v50  ;;  %v4589_v5 = vld [vmem:[#allocation8 + $0x28c] ss:$16 sps:$4 sm:$0xff]   ;;  %v4584_v50 = vld [vmem:[#allocation8 + $0x280] ss:$16 sps:$4 sm:$0xff]  }
 0x22f   :  { %2891 = vmatprep.subr.bf16.mxu0 %v4550_v52  ;;  %2977 = vmatprep.subr.bf16.mxu1 %v4553_v53  ;;  %v4587_v52 = vld [vmem:[#allocation8 + $0x288] ss:$16 sps:$4 sm:$0xff]   ;;  %v4592_v53 = vld [vmem:[#allocation8 + $0x2a4] ss:$16 sps:$4 sm:$0xff]  }
 0x232   :  { %2892 = vmatpush1.bf16.msra.mxu0 %v4548_v54  ;;  %2978 = vmatpush1.bf16.msra.mxu1 %v4551_v55  ;;  %v4595_v54 = vld [vmem:[#allocation8 + $0x2ac] ss:$16 sps:$4 sm:$0xff]   ;;  %v4590_v55 = vld [vmem:[#allocation8 + $0x2a0] ss:$16 sps:$4 sm:$0xff]  }
 0x233   :  { %2893 = vmatprep.subr.bf16.mxu0 %v4556_v3  ;;  %2979 = vmatprep.subr.bf16.mxu1 %v4559_v56  ;;  %v4593_v3 = vld [vmem:[#allocation8 + $0x2a8] ss:$16 sps:$4 sm:$0xff]   ;;  %v4598_v56 = vld [vmem:[#allocation8 + $0x2c4] ss:$16 sps:$4 sm:$0xff]  }
 0x236   :  { %2894 = vmatpush1.bf16.msra.mxu0 %v4554_v57  ;;  %2980 = vmatpush1.bf16.msra.mxu1 %v4557_v58  ;;  %v4601_v57 = vld [vmem:[#allocation8 + $0x2cc] ss:$16 sps:$4 sm:$0xff]   ;;  %v4596_v58 = vld [vmem:[#allocation8 + $0x2c0] ss:$16 sps:$4 sm:$0xff]  }
 0x237   :  { %2906 = vmatprep.subr.bf16.mxu0 %v4562_v59  ;;  %2992 = vmatprep.subr.bf16.mxu1 %v4565_v60  ;;  %v4599_v59 = vld [vmem:[#allocation8 + $0x2c8] ss:$16 sps:$4 sm:$0xff]   ;;  %v4604_v60 = vld [vmem:[#allocation8 + $0x2e4] ss:$16 sps:$4 sm:$0xff]  }
 0x2cc   :  { %v1966_v1 = vpop.f32.mrb[4].mxu0  ;;  %v2052_v2 = vpop.f32.mrb[8].mxu1 }
 0x2cd   :  { %v4020_v4 = vadd.f32 %v1966_v1, %v1232_v61  ;;  %v4024_v6 = vadd.f32 %v2052_v2, %v1240_v62  ;;  %v1968_v7 = vpop.f32.mrb[5].mxu0  ;;  %v2054_v8 = vpop.f32.mrb[9].mxu1  ;;  %v4608_v1 = vld [vmem:[#allocation8 + $0x300] ss:$16 sps:$4 sm:$0xff]   ;;  %v4611_v2 = vld [vmem:[#allocation8 + $0x308] ss:$16 sps:$4 sm:$0xff]  }
 0x2ce   :  { %v4021_v9 = vadd.f32 %v1968_v7, %v1236_v63  ;;  %v4025_v12 = vadd.f32 %v2054_v8, %v1244_v0  ;;  %v1970_v13 = vpop.f32.mrb[6].mxu0  ;;  %v2056_v14 = vpop.f32.mrb[10].mxu1  ;;  %v4614_v7 = vld [vmem:[#allocation8 + $0x320] ss:$16 sps:$4 sm:$0xff]   ;;  %v4617_v8 = vld [vmem:[#allocation8 + $0x328] ss:$16 sps:$4 sm:$0xff]  }
 0x2cf   :  { %v4022_v15 = vadd.f32 %v1970_v13, %v1232_v61  ;;  %v4026_v16 = vadd.f32 %v2056_v14, %v1240_v62  ;;  %v1972_v17 = vpop.f32.mrb[7].mxu0  ;;  %v2058_v18 = vpop.f32.mrb[11].mxu1  ;;  %v2061_v21 = vmax.f32 %v4020_v4, 0.0  ;;  %v2063_v22 = vmax.f32 %v4024_v6, 0.0  ;;  %v4602_v61 = vld [vmem:[#allocation8 + $0x2e0] ss:$16 sps:$4 sm:$0xff]  }
 0x2d0   :  { %v4023_v19 = vadd.f32 %v1972_v17, %v1236_v63  ;;  %v4027_v20 = vadd.f32 %v2058_v18, %v1244_v0  ;;  %v2062_v25 = vmax.f32 %v4021_v9, 0.0  ;;  %v2064_v26 = vmax.f32 %v4025_v12, 0.0  ;;  %v4605_v62 = vld [vmem:[#allocation8 + $0x2e8] ss:$16 sps:$4 sm:$0xff]   ;;  %v4610_v63 = vld [vmem:[#allocation8 + $0x304] ss:$16 sps:$4 sm:$0xff]  }
 0x2d1   :  { %v2065_v23 = vmax.f32 %v4022_v15, 0.0  ;;  %v2067_v24 = vmax.f32 %v4026_v16, 0.0  ;;  %v4613_v0 = vld [vmem:[#allocation8 + $0x30c] ss:$16 sps:$4 sm:$0xff]   ;;  %v4616_v4 = vld [vmem:[#allocation8 + $0x324] ss:$16 sps:$4 sm:$0xff]  }
 0x2d2   :  { %v2066_v27 = vmax.f32 %v4023_v19, 0.0  ;;  %v2068_v28 = vmax.f32 %v4027_v20, 0.0  ;;  %v4619_v6 = vld [vmem:[#allocation8 + $0x32c] ss:$16 sps:$4 sm:$0xff]   ;;  %v4622_v9 = vld [vmem:[#allocation8 + $0x344] ss:$16 sps:$4 sm:$0xff]  }
 0x2d3   :  { %v2069_v29 = vpack.c.bf16 %v2065_v23, %v2061_v21  ;;  %v5084_v30 = vpack.c.bf16 %v2067_v24, %v2063_v22  ;;  %v4625_v12 = vld [vmem:[#allocation8 + $0x34c] ss:$16 sps:$4 sm:$0xff]   ;;  %v4620_v13 = vld [vmem:[#allocation8 + $0x340] ss:$16 sps:$4 sm:$0xff]   ;;  %v4623_v14 = vld [vmem:[#allocation8 + $0x348] ss:$16 sps:$4 sm:$0xff]  }
 0x2d4   :  { %v2070_v31 = vpack.c.bf16 %v2066_v27, %v2062_v25  ;;  %v2072_v32 = vpack.c.bf16 %v2068_v28, %v2064_v26  ;;  %v4628_v15 = vld [vmem:[#allocation8 + $0x364] ss:$16 sps:$4 sm:$0xff]   ;;  %v4631_v16 = vld [vmem:[#allocation8 + $0x36c] ss:$16 sps:$4 sm:$0xff]   ;;  %v4626_v17 = vld [vmem:[#allocation8 + $0x360] ss:$16 sps:$4 sm:$0xff]  }
 0x2d5   :  { %v4629_v18 = vld [vmem:[#allocation8 + $0x368] ss:$16 sps:$4 sm:$0xff]   ;;  %v4634_v19 = vld [vmem:[#allocation8 + $0x384] ss:$16 sps:$4 sm:$0xff]   ;;  %v4637_v20 = vld [vmem:[#allocation8 + $0x38c] ss:$16 sps:$4 sm:$0xff]  }
 0x2d6   :  { %2895 = vmatprep.mubr.bf16.mxu0 %v2070_v31  ;;  %2981 = vmatprep.mubr.bf16.mxu1 %v2070_v31  ;;  %v4632_v21 = vld [vmem:[#allocation8 + $0x380] ss:$16 sps:$4 sm:$0xff]   ;;  %v4635_v22 = vld [vmem:[#allocation8 + $0x388] ss:$16 sps:$4 sm:$0xff]   ;;  %v4640_v23 = vld [vmem:[#allocation8 + $0x3a4] ss:$16 sps:$4 sm:$0xff]  }
 0x2d7   :  { %2896 = vmatmul.mubr.bf16.vlgmr.msra.gmra.mrb[8].mxu0 %v2069_v29  ;;  %2982 = vmatmul.mubr.bf16.vlgmr.msra.gmra.mrb[12].mxu1 %v2069_v29  ;;  %v4643_v24 = vld [vmem:[#allocation8 + $0x3ac] ss:$16 sps:$4 sm:$0xff]   ;;  %v4638_v25 = vld [vmem:[#allocation8 + $0x3a0] ss:$16 sps:$4 sm:$0xff]   ;;  %v4641_v26 = vld [vmem:[#allocation8 + $0x3a8] ss:$16 sps:$4 sm:$0xff]  }
 0x2d8   :  { %2907 = vmatpush1.bf16.msra.mxu0 %v4560_v33  ;;  %2993 = vmatpush1.bf16.msra.mxu1 %v4563_v34  ;;  %v4646_v27 = vld [vmem:[#allocation8 + $0x3c4] ss:$16 sps:$4 sm:$0xff]   ;;  %v4649_v28 = vld [vmem:[#allocation8 + $0x3cc] ss:$16 sps:$4 sm:$0xff]   ;;  %v4644_v29 = vld [vmem:[#allocation8 + $0x3c0] ss:$16 sps:$4 sm:$0xff]  }
 0x2d9   :  { %2938 = vmatprep.mubr.bf16.mxu0 %v2072_v32  ;;  %3024 = vmatprep.mubr.bf16.mxu1 %v2072_v32  ;;  %v4647_v31 = vld [vmem:[#allocation8 + $0x3c8] ss:$16 sps:$4 sm:$0xff]   ;;  %v4652_v32 = vld [vmem:[#allocation8 + $0x3e4] ss:$16 sps:$4 sm:$0xff]   ;;  %v4655_v33 = vld [vmem:[#allocation8 + $0x3ec] ss:$16 sps:$4 sm:$0xff]  }
 0x2da   :  { %2908 = vmatprep.subr.bf16.mxu0 %v4568_v35  ;;  %2994 = vmatprep.subr.bf16.mxu1 %v4571_v36  ;;  %v4650_v34 = vld [vmem:[#allocation8 + $0x3e0] ss:$16 sps:$4 sm:$0xff]   ;;  %v4653_v35 = vld [vmem:[#allocation8 + $0x3e8] ss:$16 sps:$4 sm:$0xff]   ;;  %v4658_v36 = vld [vmem:[#allocation10 + $0x4] ss:$8 sps:$4 sm:$0xff]  }
 0x2dc   :  { %2909 = vmatpush1.bf16.msra.mxu0 %v4566_v37  ;;  %2995 = vmatpush1.bf16.msra.mxu1 %v4569_v38  ;;  %v4656_v37 = vld [vmem:[#allocation10] ss:$8 sps:$4 sm:$0xff]   ;;  %v4661_v38 = vld [vmem:[#allocation10 + $0x14] ss:$8 sps:$4 sm:$0xff]  }
 0x2dd   :  { %2910 = vmatprep.subr.bf16.mxu0 %v4574_v39  ;;  %2996 = vmatprep.subr.bf16.mxu1 %v4577_v42  ;;  %v4659_v39 = vld [vmem:[#allocation10 + $0x10] ss:$8 sps:$4 sm:$0xff]   ;;  %v4664_v42 = vld [vmem:[#allocation10 + $0x24] ss:$8 sps:$4 sm:$0xff]  }
 0x2e0   :  { %2911 = vmatpush1.bf16.msra.mxu0 %v4572_v43  ;;  %2997 = vmatpush1.bf16.msra.mxu1 %v4575_v44  ;;  %v4662_v43 = vld [vmem:[#allocation10 + $0x20] ss:$8 sps:$4 sm:$0xff]   ;;  %v4667_v44 = vld [vmem:[#allocation10 + $0x34] ss:$8 sps:$4 sm:$0xff]  }
 0x2e1   :  { %2912 = vmatprep.subr.bf16.mxu0 %v4580_v45  ;;  %2998 = vmatprep.subr.bf16.mxu1 %v4583_v46  ;;  %v4665_v45 = vld [vmem:[#allocation10 + $0x30] ss:$8 sps:$4 sm:$0xff]   ;;  %v4670_v46 = vld [vmem:[#allocation10 + $0x44] ss:$8 sps:$4 sm:$0xff]  }
 0x2e4   :  { %2913 = vmatpush1.bf16.msra.mxu0 %v4578_v47  ;;  %2999 = vmatpush1.bf16.msra.mxu1 %v4581_v48  ;;  %v4668_v47 = vld [vmem:[#allocation10 + $0x40] ss:$8 sps:$4 sm:$0xff]   ;;  %v4673_v48 = vld [vmem:[#allocation10 + $0x54] ss:$8 sps:$4 sm:$0xff]  }
 0x2e5   :  { %2914 = vmatprep.subr.bf16.mxu0 %v4586_v49  ;;  %3000 = vmatprep.subr.bf16.mxu1 %v4589_v5  ;;  %v4671_v49 = vld [vmem:[#allocation10 + $0x50] ss:$8 sps:$4 sm:$0xff]   ;;  %v4674_v5 = vld [vmem:[#allocation10 + $0x60] ss:$8 sps:$4 sm:$0xff]  }
 0x2e8   :  { %2915 = vmatpush1.bf16.msra.mxu0 %v4584_v50  ;;  %3001 = vmatpush1.bf16.msra.mxu1 %v4587_v52  ;;  %v4679_v50 = vld [vmem:[#allocation10 + $0x74] ss:$8 sps:$4 sm:$0xff]   ;;  %v4677_v52 = vld [vmem:[#allocation10 + $0x70] ss:$8 sps:$4 sm:$0xff]  }
 0x2e9   :  { %2916 = vmatprep.subr.bf16.mxu0 %v4592_v53  ;;  %3002 = vmatprep.subr.bf16.mxu1 %v4595_v54  ;;  %v4682_v53 = vld [vmem:[#allocation10 + $0x84] ss:$8 sps:$4 sm:$0xff]   ;;  %v4680_v54 = vld [vmem:[#allocation10 + $0x80] ss:$8 sps:$4 sm:$0xff]  }
 0x2ec   :  { %2917 = vmatpush1.bf16.msra.mxu0 %v4590_v55  ;;  %3003 = vmatpush1.bf16.msra.mxu1 %v4593_v3  ;;  %v4685_v55 = vld [vmem:[#allocation10 + $0x94] ss:$8 sps:$4 sm:$0xff]   ;;  %v4683_v3 = vld [vmem:[#allocation10 + $0x90] ss:$8 sps:$4 sm:$0xff]  }
 0x2ed   :  { %2918 = vmatprep.subr.bf16.mxu0 %v4598_v56  ;;  %3004 = vmatprep.subr.bf16.mxu1 %v4601_v57  ;;  %v4688_v56 = vld [vmem:[#allocation10 + $0xa4] ss:$8 sps:$4 sm:$0xff]   ;;  %v4686_v57 = vld [vmem:[#allocation10 + $0xa0] ss:$8 sps:$4 sm:$0xff]  }
 0x2f0   :  { %2919 = vmatpush1.bf16.msra.mxu0 %v4596_v58  ;;  %3005 = vmatpush1.bf16.msra.mxu1 %v4599_v59  ;;  %v4691_v58 = vld [vmem:[#allocation10 + $0xb4] ss:$8 sps:$4 sm:$0xff]   ;;  %v4689_v59 = vld [vmem:[#allocation10 + $0xb0] ss:$8 sps:$4 sm:$0xff]  }
 0x2f1   :  { %2920 = vmatprep.subr.bf16.mxu0 %v4604_v60  ;;  %3006 = vmatprep.subr.bf16.mxu1 %v4607_v51  ;;  %v4694_v60 = vld [vmem:[#allocation10 + $0xc4] ss:$8 sps:$4 sm:$0xff]   ;;  %v4692_v51 = vld [vmem:[#allocation10 + $0xc0] ss:$8 sps:$4 sm:$0xff]  }
 0x2f4   :  { %2921 = vmatpush1.bf16.msra.mxu0 %v4602_v61  ;;  %3007 = vmatpush1.bf16.msra.mxu1 %v4605_v62  ;;  %v4697_v61 = vld [vmem:[#allocation10 + $0xd4] ss:$8 sps:$4 sm:$0xff]   ;;  %v4695_v62 = vld [vmem:[#allocation10 + $0xd0] ss:$8 sps:$4 sm:$0xff]  }
 0x2f5   :  { %2922 = vmatprep.subr.bf16.mxu0 %v4610_v63  ;;  %3008 = vmatprep.subr.bf16.mxu1 %v4613_v0  ;;  %v4700_v63 = vld [vmem:[#allocation10 + $0xe4] ss:$8 sps:$4 sm:$0xff]   ;;  %v4698_v0 = vld [vmem:[#allocation10 + $0xe0] ss:$8 sps:$4 sm:$0xff]  }
 0x2f8   :  { %2923 = vmatpush1.bf16.msra.mxu0 %v4608_v1  ;;  %3009 = vmatpush1.bf16.msra.mxu1 %v4611_v2  ;;  %v4703_v1 = vld [vmem:[#allocation10 + $0xf4] ss:$8 sps:$4 sm:$0xff]   ;;  %v4701_v2 = vld [vmem:[#allocation10 + $0xf0] ss:$8 sps:$4 sm:$0xff]  }
 0x2f9   :  { %2924 = vmatprep.subr.bf16.mxu0 %v4616_v4  ;;  %3010 = vmatprep.subr.bf16.mxu1 %v4619_v6  ;;  %v4706_v4 = vld [vmem:[#allocation10 + $0x104] ss:$8 sps:$4 sm:$0xff]   ;;  %v2201_v6 = vld [vmem:[%s5124_s6] sm:$0xf] }
 0x2fc   :  { %2925 = vmatpush1.bf16.msra.mxu0 %v4614_v7  ;;  %3011 = vmatpush1.bf16.msra.mxu1 %v4617_v8  ;;  %v2206_v7 = vrot.slane %v2201_v6, %v5053_v10  ;;  %v2214_v8 = vrot.slane %v2201_v6, %v5068_v40 }
 0x2fd   :  { %2926 = vmatprep.subr.bf16.mxu0 %v4622_v9  ;;  %3012 = vmatprep.subr.bf16.mxu1 %v4625_v12  ;;  %v2210_v9 = vrot.slane %v2201_v6, %v5061_v11  ;;  %v2218_v12 = vrot.slane %v2201_v6, %v5071_v41  ;;  %v4751_v6 = vld [vmem:[#allocation10 + $0x1f4] ss:$8 sps:$4 sm:$0xff]  }
 0x300   :  { %2927 = vmatpush1.bf16.msra.mxu0 %v4620_v13  ;;  %3013 = vmatpush1.bf16.msra.mxu1 %v4623_v14 }
 0x301   :  { %2928 = vmatprep.subr.bf16.mxu0 %v4628_v15  ;;  %3014 = vmatprep.subr.bf16.mxu1 %v4631_v16 }
 0x304   :  { %2929 = vmatpush1.bf16.msra.mxu0 %v4626_v17  ;;  %3015 = vmatpush1.bf16.msra.mxu1 %v4629_v18 }
 0x305   :  { %2930 = vmatprep.subr.bf16.mxu0 %v4634_v19  ;;  %3016 = vmatprep.subr.bf16.mxu1 %v4637_v20 }
 0x308   :  { %2931 = vmatpush1.bf16.msra.mxu0 %v4632_v21  ;;  %3017 = vmatpush1.bf16.msra.mxu1 %v4635_v22 }
 0x309   :  { %2932 = vmatprep.subr.bf16.mxu0 %v4640_v23  ;;  %3018 = vmatprep.subr.bf16.mxu1 %v4643_v24 }
 0x30c   :  { %2933 = vmatpush1.bf16.msra.mxu0 %v4638_v25  ;;  %3019 = vmatpush1.bf16.msra.mxu1 %v4641_v26 }
 0x30d   :  { %2934 = vmatprep.subr.bf16.mxu0 %v4646_v27  ;;  %3020 = vmatprep.subr.bf16.mxu1 %v4649_v28 }
 0x310   :  { %2935 = vmatpush1.bf16.msra.mxu0 %v4644_v29  ;;  %3021 = vmatpush1.bf16.msra.mxu1 %v4647_v31 }
 0x311   :  { %2936 = vmatprep.subr.bf16.mxu0 %v4652_v32  ;;  %3022 = vmatprep.subr.bf16.mxu1 %v4655_v33 }
 0x314   :  { %2937 = vmatpush1.bf16.msra.mxu0 %v4650_v34  ;;  %3023 = vmatpush1.bf16.msra.mxu1 %v4653_v35 }
 0x315   :  { %3443 = vmatprep.subr.bf16.mxu0 %v4658_v36 }
 0x317   :  { %2939 = vmatmul.mubr.bf16.vlgmr.msra.gmra.mrb[8].mxu0 %v5084_v30  ;;  %3025 = vmatmul.mubr.bf16.vlgmr.msra.gmra.mrb[12].mxu1 %v5084_v30  ;;  %v4676_v30 = vld [vmem:[#allocation10 + $0x64] ss:$8 sps:$4 sm:$0xff]  }
 0x318   :  { %3444 = vmatpush1.bf16.msra.mxu0 %v4656_v37 }
 0x319   :  { %3445 = vmatprep.subr.bf16.mxu0 %v4661_v38 }
 0x31c   :  { %3446 = vmatpush1.bf16.msra.mxu0 %v4659_v39 }
 0x31d   :  { %3447 = vmatprep.subr.bf16.mxu0 %v4664_v42  ;;  %v4704_v42 = vld [vmem:[#allocation10 + $0x100] ss:$8 sps:$4 sm:$0xff]  }
 0x320   :  { %3448 = vmatpush1.bf16.msra.mxu0 %v4662_v43  ;;  %v4709_v43 = vld [vmem:[#allocation10 + $0x114] ss:$8 sps:$4 sm:$0xff]  }
 0x321   :  { %3449 = vmatprep.subr.bf16.mxu0 %v4667_v44  ;;  %v4707_v44 = vld [vmem:[#allocation10 + $0x110] ss:$8 sps:$4 sm:$0xff]  }
 0x324   :  { %3450 = vmatpush1.bf16.msra.mxu0 %v4665_v45  ;;  %v4712_v45 = vld [vmem:[#allocation10 + $0x124] ss:$8 sps:$4 sm:$0xff]  }
 0x325   :  { %3451 = vmatprep.subr.bf16.mxu0 %v4670_v46  ;;  %v4710_v46 = vld [vmem:[#allocation10 + $0x120] ss:$8 sps:$4 sm:$0xff]  }
 0x328   :  { %3452 = vmatpush1.bf16.msra.mxu0 %v4668_v47  ;;  %v4715_v47 = vld [vmem:[#allocation10 + $0x134] ss:$8 sps:$4 sm:$0xff]  }
 0x329   :  { %3453 = vmatprep.subr.bf16.mxu0 %v4673_v48  ;;  %v4713_v48 = vld [vmem:[#allocation10 + $0x130] ss:$8 sps:$4 sm:$0xff]  }
 0x32c   :  { %3454 = vmatpush1.bf16.msra.mxu0 %v4671_v49  ;;  %v4718_v49 = vld [vmem:[#allocation10 + $0x144] ss:$8 sps:$4 sm:$0xff]  }
 0x32d   :  { %3455 = vmatprep.subr.bf16.mxu0 %v4676_v30  ;;  %v4716_v30 = vld [vmem:[#allocation10 + $0x140] ss:$8 sps:$4 sm:$0xff]  }
 0x330   :  { %3456 = vmatpush1.bf16.msra.mxu0 %v4674_v5  ;;  %v4721_v5 = vld [vmem:[#allocation10 + $0x154] ss:$8 sps:$4 sm:$0xff]  }
 0x331   :  { %3457 = vmatprep.subr.bf16.mxu0 %v4679_v50  ;;  %v4719_v50 = vld [vmem:[#allocation10 + $0x150] ss:$8 sps:$4 sm:$0xff]  }
 0x334   :  { %3458 = vmatpush1.bf16.msra.mxu0 %v4677_v52  ;;  %v4724_v52 = vld [vmem:[#allocation10 + $0x164] ss:$8 sps:$4 sm:$0xff]  }
 0x335   :  { %3459 = vmatprep.subr.bf16.mxu0 %v4682_v53  ;;  %v4722_v53 = vld [vmem:[#allocation10 + $0x160] ss:$8 sps:$4 sm:$0xff]  }
 0x338   :  { %3460 = vmatpush1.bf16.msra.mxu0 %v4680_v54  ;;  %v4727_v54 = vld [vmem:[#allocation10 + $0x174] ss:$8 sps:$4 sm:$0xff]  }
 0x339   :  { %3461 = vmatprep.subr.bf16.mxu0 %v4685_v55  ;;  %v4725_v55 = vld [vmem:[#allocation10 + $0x170] ss:$8 sps:$4 sm:$0xff]  }
 0x33c   :  { %3462 = vmatpush1.bf16.msra.mxu0 %v4683_v3  ;;  %v4730_v3 = vld [vmem:[#allocation10 + $0x184] ss:$8 sps:$4 sm:$0xff]  }
 0x33d   :  { %3463 = vmatprep.subr.bf16.mxu0 %v4688_v56  ;;  %v4728_v56 = vld [vmem:[#allocation10 + $0x180] ss:$8 sps:$4 sm:$0xff]  }
 0x340   :  { %3464 = vmatpush1.bf16.msra.mxu0 %v4686_v57  ;;  %v4733_v57 = vld [vmem:[#allocation10 + $0x194] ss:$8 sps:$4 sm:$0xff]  }
 0x341   :  { %3465 = vmatprep.subr.bf16.mxu0 %v4691_v58  ;;  %v4731_v58 = vld [vmem:[#allocation10 + $0x190] ss:$8 sps:$4 sm:$0xff]  }
 0x344   :  { %3466 = vmatpush1.bf16.msra.mxu0 %v4689_v59  ;;  %v4736_v59 = vld [vmem:[#allocation10 + $0x1a4] ss:$8 sps:$4 sm:$0xff]  }
 0x345   :  { %3467 = vmatprep.subr.bf16.mxu0 %v4694_v60  ;;  %v4734_v60 = vld [vmem:[#allocation10 + $0x1a0] ss:$8 sps:$4 sm:$0xff]  }
 0x348   :  { %3468 = vmatpush1.bf16.msra.mxu0 %v4692_v51  ;;  %v4739_v51 = vld [vmem:[#allocation10 + $0x1b4] ss:$8 sps:$4 sm:$0xff]  }
 0x349   :  { %3469 = vmatprep.subr.bf16.mxu0 %v4697_v61  ;;  %v4737_v61 = vld [vmem:[#allocation10 + $0x1b0] ss:$8 sps:$4 sm:$0xff]  }
 0x34c   :  { %3470 = vmatpush1.bf16.msra.mxu0 %v4695_v62  ;;  %v4742_v62 = vld [vmem:[#allocation10 + $0x1c4] ss:$8 sps:$4 sm:$0xff]  }
 0x34d   :  { %3471 = vmatprep.subr.bf16.mxu0 %v4700_v63  ;;  %v4740_v63 = vld [vmem:[#allocation10 + $0x1c0] ss:$8 sps:$4 sm:$0xff]  }
 0x350   :  { %3472 = vmatpush1.bf16.msra.mxu0 %v4698_v0  ;;  %v4745_v0 = vld [vmem:[#allocation10 + $0x1d4] ss:$8 sps:$4 sm:$0xff]  }
 0x351   :  { %3473 = vmatprep.subr.bf16.mxu0 %v4703_v1  ;;  %v4743_v1 = vld [vmem:[#allocation10 + $0x1d0] ss:$8 sps:$4 sm:$0xff]  }
 0x354   :  { %3474 = vmatpush1.bf16.msra.mxu0 %v4701_v2  ;;  %v4748_v2 = vld [vmem:[#allocation10 + $0x1e4] ss:$8 sps:$4 sm:$0xff]  }
 0x355   :  { %3486 = vmatprep.subr.bf16.mxu0 %v4706_v4  ;;  %v4746_v4 = vld [vmem:[#allocation10 + $0x1e0] ss:$8 sps:$4 sm:$0xff]  }
 0x3ea   :  { %v2940_v13 = vpop.f32.mrb[8].mxu0  ;;  %v3026_v14 = vpop.f32.mrb[12].mxu1 }
 0x3eb   :  { %v4028_v15 = vadd.f32 %v2940_v13, %v2206_v7  ;;  %v4032_v16 = vadd.f32 %v3026_v14, %v2214_v8  ;;  %v2942_v17 = vpop.f32.mrb[9].mxu0  ;;  %v3028_v18 = vpop.f32.mrb[13].mxu1 }
 0x3ec   :  { %v4029_v19 = vadd.f32 %v2942_v17, %v2210_v9  ;;  %v4033_v20 = vadd.f32 %v3028_v18, %v2218_v12  ;;  %v2944_v21 = vpop.f32.mrb[10].mxu0  ;;  %v3030_v22 = vpop.f32.mrb[14].mxu1 }
 0x3ed   :  { %v4030_v23 = vadd.f32 %v2944_v21, %v2206_v7  ;;  %v4034_v24 = vadd.f32 %v3030_v22, %v2214_v8  ;;  %v2946_v25 = vpop.f32.mrb[11].mxu0  ;;  %v3032_v26 = vpop.f32.mrb[15].mxu1  ;;  %v3035_v28 = vmax.f32 %v4028_v15, 0.0  ;;  %v3037_v29 = vmax.f32 %v4032_v16, 0.0  ;;  %v4749_v7 = vld [vmem:[#allocation10 + $0x1f0] ss:$8 sps:$4 sm:$0xff]  }
 0x3ee   :  { %v4031_v27 = vadd.f32 %v2946_v25, %v2210_v9  ;;  %v4035_v40 = vadd.f32 %v3032_v26, %v2218_v12  ;;  %v3036_v32 = vmax.f32 %v4029_v19, 0.0  ;;  %v3038_v33 = vmax.f32 %v4033_v20, 0.0  ;;  %v3111_v8 = vld [vmem:[%s5126_s8] sm:$0x3]  ;;  %s4862_s8 = scalar_lea.vmem %s3543_s10, 512 }
 0x3ef   :  { %v3039_v31 = vmax.f32 %v4030_v23, 0.0  ;;  %v3041_v41 = vmax.f32 %v4034_v24, 0.0  ;;  %v3116_v9 = vrot.slane %v3111_v8, %v5053_v10  ;;  %v3120_v12 = vrot.slane %v3111_v8, %v5061_v11  ;;  %p4863_p12 = scmp.ne.s32.totalorder %s3543_s10, %s4862_s8  ;;  %p4868_p0 = scmp.lt.s32.totalorder %s4862_s8, %s4862_s8 }
 0x3f0   :  { %v3040_v34 = vmax.f32 %v4031_v27, 0.0  ;;  %v3042_v35 = vmax.f32 %v4035_v40, 0.0 }
 0x3f1   :  { %v3043_v36 = vpack.c.bf16 %v3039_v31, %v3035_v28  ;;  %v5095_v37 = vpack.c.bf16 %v3041_v41, %v3037_v29  ;;  %p4869_p1 = por %p4868_p0, %p4867_p13 }
 0x3f2   :  { %v3044_v38 = vpack.c.bf16 %v3040_v34, %v3036_v32  ;;  %v3046_v39 = vpack.c.bf16 %v3042_v35, %v3038_v33 }
 0x3f3   :  { %p4870_p2 = pnand %p4869_p1, %p4863_p12 }
 0x3f4   :  { %3475 = vmatprep.mubr.bf16.mxu0 %v3044_v38 }
 0x3f5   :  { %3476 = vmatmul.mubr.bf16.vlgmr.msra.gmra.mrb[12].mxu0 %v3043_v36 }
 0x3f6   :  { %3487 = vmatpush1.bf16.msra.mxu0 %v4704_v42  ;;  %3518 = vmatprep.mubr.bf16.mxu0 %v3046_v39 }
 0x3f7   :  { %3488 = vmatprep.subr.bf16.mxu0 %v4709_v43 }
 0x3fa   :  { %3489 = vmatpush1.bf16.msra.mxu0 %v4707_v44 }
 0x3fb   :  { %3490 = vmatprep.subr.bf16.mxu0 %v4712_v45 }
 0x3fe   :  { %3491 = vmatpush1.bf16.msra.mxu0 %v4710_v46 }
 0x3ff   :  { %3492 = vmatprep.subr.bf16.mxu0 %v4715_v47 }
 0x402   :  { %3493 = vmatpush1.bf16.msra.mxu0 %v4713_v48 }
 0x403   :  { %3494 = vmatprep.subr.bf16.mxu0 %v4718_v49 }
 0x406   :  { %3495 = vmatpush1.bf16.msra.mxu0 %v4716_v30 }
 0x407   :  { %3496 = vmatprep.subr.bf16.mxu0 %v4721_v5 }
 0x40a   :  { %3497 = vmatpush1.bf16.msra.mxu0 %v4719_v50 }
 0x40b   :  { %3498 = vmatprep.subr.bf16.mxu0 %v4724_v52 }
 0x40e   :  { %3499 = vmatpush1.bf16.msra.mxu0 %v4722_v53 }
 0x40f   :  { %3500 = vmatprep.subr.bf16.mxu0 %v4727_v54 }
 0x412   :  { %3501 = vmatpush1.bf16.msra.mxu0 %v4725_v55 }
 0x413   :  { %3502 = vmatprep.subr.bf16.mxu0 %v4730_v3 }
 0x416   :  { %3503 = vmatpush1.bf16.msra.mxu0 %v4728_v56 }
 0x417   :  { %3504 = vmatprep.subr.bf16.mxu0 %v4733_v57 }
 0x41a   :  { %3505 = vmatpush1.bf16.msra.mxu0 %v4731_v58 }
 0x41b   :  { %3506 = vmatprep.subr.bf16.mxu0 %v4736_v59 }
 0x41e   :  { %3507 = vmatpush1.bf16.msra.mxu0 %v4734_v60 }
 0x41f   :  { %3508 = vmatprep.subr.bf16.mxu0 %v4739_v51 }
 0x422   :  { %3509 = vmatpush1.bf16.msra.mxu0 %v4737_v61 }
 0x423   :  { %3510 = vmatprep.subr.bf16.mxu0 %v4742_v62 }
 0x426   :  { %3511 = vmatpush1.bf16.msra.mxu0 %v4740_v63 }
 0x427   :  { %3512 = vmatprep.subr.bf16.mxu0 %v4745_v0 }
 0x42a   :  { %3513 = vmatpush1.bf16.msra.mxu0 %v4743_v1 }
 0x42b   :  { %3514 = vmatprep.subr.bf16.mxu0 %v4748_v2 }
 0x42e   :  { %3515 = vmatpush1.bf16.msra.mxu0 %v4746_v4 }
 0x42f   :  { %3516 = vmatprep.subr.bf16.mxu0 %v4751_v6 }
 0x432   :  { %3517 = vmatpush1.bf16.msra.mxu0 %v4749_v7 }
 0x435   :  { %3519 = vmatmul.mubr.bf16.vlgmr.msra.gmra.mrb[12].mxu0 %v5095_v37 }
 0x508   :  { %v3520_v13 = vpop.f32.mrb[12].mxu0 }
 0x509   :  { %v4036_v14 = vadd.f32 %v3520_v13, %v3116_v9  ;;  %v3522_v15 = vpop.f32.mrb[13].mxu0 }
 0x50a   :  { %v4037_v16 = vadd.f32 %v3522_v15, %v3120_v12  ;;  %v3524_v17 = vpop.f32.mrb[14].mxu0 }
 0x50b   :  { %v3529_v18 = vmax.f32 %v4036_v14, 0.0  ;;  %v4038_v19 = vadd.f32 %v3524_v17, %v3116_v9  ;;  %v3526_v20 = vpop.f32.mrb[15].mxu0 }
 0x50c   :  { %v3530_v21 = vmax.f32 %v4037_v16, 0.0  ;;  %v4039_v22 = vadd.f32 %v3526_v20, %v3120_v12 }
 0x50d   :  { %3533 = vst [vmem:[#allocation11] sm:$0xff] %v3529_v18  ;;  %v3531_v23 = vmax.f32 %v4038_v19, 0.0 }
 0x50e   :  { %3534 = vst [vmem:[#allocation11 + $0x8] sm:$0xff] %v3530_v21  ;;  %v3532_v24 = vmax.f32 %v4039_v22, 0.0 }
 0x50f   :  { %3535 = vst [vmem:[#allocation11 + $0x10] sm:$0xff] %v3531_v23 }
 0x510   :  { %3536 = vst [vmem:[#allocation11 + $0x18] sm:$0xff] %v3532_v24 }
 0x511   :  { %4873 = shalt.err (!%p4870_p2)
}
 0x512   :  { %s4874_s15 = scalar_lea.hbm %s5127_s9, 512 }
 0x513   :  { %p4875_p3 = scmp.ne.s32.totalorder %s5127_s9, %s4874_s15  ;;  %p4878_p4 = scmp.lt.u32.totalorder %s4874_s15, %s5127_s9 }
 0x515   :  { %p4880_p5 = pnand %p4878_p4, %p4875_p3 }
 0x517   :  { %4883 = shalt.err (!%p4880_p5)
}
 0x518   :  { %3548 = dma.vmem_to_hbm [thread:$0]  %s3543_s10, 512, %s5127_s9, [#allocation4], %s4894_s21, %s4894_s21, %s4895_s22  }
 0x519   :  { %4890 = dma.done.wait [#allocation4], 512  }
 0x51a   :  { %4891 = vsyncadd [#allocation4], 4294966784 }
 0x51b   :  { %3552 = vsyncpa [#allocation3], 1 }
 0x51c   :  { %3553 = vsyncpa [#allocation6], 1 }
 0x51d   :  { %3554 = vsyncpa [#allocation9], 1 }
 0x51e   :  { %3555 = vsyncpa [#allocation4], 1 }

</bundles_post_ra>
